<compile_context>
chip_gen: v6e
topology: v6e:2x2x1
jax: 0.10.0
libtpu: 0.0.40
codegen_flags: <defaults>
</compile_context>

<pallas_src>
import functools

import jax
import jax.numpy as jnp
from jax.experimental import pallas as pl
from jax.experimental.pallas import tpu as pltpu

LANE = 128  # pad the fc1 feature dim to one full lane register width


def net1_kernel(x_ref, w1_ref, b1_ref, w2_ref, b2_ref, o_ref):
    # In-kernel f32 -> bf16 cast (VPU slot has slack; avoids a second HBM copy of x).
    xb = x_ref[...].astype(jnp.bfloat16)
    # fc1: bf16 MXU matmul, f32 accumulate; bias + ReLU in f32 (VPU).
    h = jnp.dot(xb, w1_ref[...], preferred_element_type=jnp.float32)   # (TB, 128)
    h = jnp.maximum(h + b1_ref[...], 0.0)
    # fc2: single real output column -> VPU multiply + lane (XLU) reduce instead of a
    # padded 128-wide MXU pass. Padded lanes of h and w2 are zero, so no contamination.
    y = jnp.sum(h * w2_ref[...], axis=-1, keepdims=True) + b2_ref[0, 0]  # (TB, 1)
    o_ref[...] = jnp.maximum(y, 0.0)


def prepare_params(w1, b1, w2, b2):
    """One-time padding / layout prep (PyTorch layout -> lane-friendly layout).

    w1: (101, n), b1: (101,), w2: (1, 100), b2: (1,)
    """
    n = w1.shape[1]
    w1_p = (
        jnp.zeros((n, LANE), jnp.bfloat16).at[:, :101].set(w1.T.astype(jnp.bfloat16))
    )                                                                  # (n, 128) bf16
    b1_p = jnp.zeros((1, LANE), jnp.float32).at[0, :101].set(b1)       # (1, 128) f32
    w2_p = jnp.zeros((1, LANE), jnp.float32).at[0, :100].set(w2[0])    # (1, 128) f32
    b2_p = b2.reshape(1, 1).astype(jnp.float32)                        # (1, 1)   f32, -> SMEM
    return w1_p, b1_p, w2_p, b2_p


@functools.lru_cache(maxsize=None)
def _tensorcores_per_chip():
    """Heuristic: v7x exposes 2 TensorCores per chip; v5e/v6e expose 1."""
    try:
        kind = jax.devices()[0].device_kind.lower()
    except Exception:
        return 1
    return 2 if "v7" in kind else 1


def _select_tile_rows(B, n, num_tc):
    """Pick the batch-tile row count (static, from shapes only)."""
    # Target >= ~1 MiB of f32 x per grid step to amortize ~0.35us/step overhead.
    tb = max(256, (1 << 20) // (4 * n))
    # On multi-TC parts keep >= num_tc grid steps so the "parallel" axis shards work.
    if num_tc >= 2:
        tb = min(tb, pl.cdiv(B, num_tc))
    # Cap the VMEM footprint (~40 MiB budget; v7x has 64 MiB physical VMEM):
    #   double-buffered f32 x tiles + f32 h intermediate + double-buffered out tiles.
    while tb > 256 and (2 * tb * n * 4 + tb * LANE * 4 + 2 * tb * 4) > (40 << 20):
        tb //= 2
    if tb >= B:
        return B                       # single block == full array dim: always legal
    return max(8, (tb // 8) * 8)       # sublane-aligned partial tiles


@jax.jit
def net1_forward(x, w1_p, b1_p, w2_p, b2_p):
    """x: (B, n) f32; params from prepare_params(). Returns (B, 1) f32."""
    B, n = x.shape
    num_tc = _tensorcores_per_chip()
    tb = _select_tile_rows(B, n, num_tc)
    grid = (pl.cdiv(B, tb),)

    # VMEM budget actually needed (with headroom for f32 intermediates), capped for v7x.
    vmem_need = (2 * tb * n * 4            # double-buffered f32 x tiles
                 + 2 * tb * 4              # double-buffered (tb, 1) f32 out tiles
                 + n * LANE * 2 + 2 * LANE * 4   # resident weights / bias
                 + 3 * tb * LANE * 4)      # f32 intermediates (h, h*w2)
    vmem_limit = min(48 << 20, max(16 << 20, 2 * vmem_need))

    cost = pl.CostEstimate(
        flops=2 * B * n * LANE + 5 * B * LANE,     # fc1 matmul + bias/relu + fc2 mul/reduce
        transcendentals=0,
        bytes_accessed=(B * n * 4)                 # f32 x read (no wrapper-side bf16 copy)
        + (n * LANE * 2) + (2 * LANE * 4) + 4      # weights / biases
        + (B * 4),                                 # (B, 1) f32 output
    )

    return pl.pallas_call(
        net1_kernel,
        out_shape=jax.ShapeDtypeStruct((B, 1), jnp.float32),
        grid=grid,
        in_specs=[
            pl.BlockSpec((tb, n), lambda i: (i, 0)),      # x tile, streams with the grid
            pl.BlockSpec((n, LANE), lambda i: (0, 0)),    # weights: same block every step
            pl.BlockSpec((1, LANE), lambda i: (0, 0)),
            pl.BlockSpec((1, LANE), lambda i: (0, 0)),
            pl.BlockSpec(memory_space=pltpu.MemorySpace.SMEM),   # b2 scalar lives in SMEM
        ],
        out_specs=pl.BlockSpec((tb, 1), lambda i: (i, 0)),
        # TODO(synk): lane-dense (B//128, 128) output slab would remove masked vst.msk
        # stores, but changes the caller-visible shape contract, so it is not done here.
        compiler_params=pltpu.CompilerParams(
            dimension_semantics=("parallel",),            # shard batch grid across v7x's 2 TCs
            vmem_limit_bytes=vmem_limit,
        ),
        cost_estimate=cost,
    )(x, w1_p, b1_p, w2_p, b2_p)


def net1_reference(x, w1, b1, w2, b2):
    """Pure-JAX reference of the (shape-corrected) forward, matching the bf16 MXU inputs."""
    xb = x.astype(jnp.bfloat16).astype(jnp.float32)
    w1b = w1.astype(jnp.bfloat16).astype(jnp.float32)
    h = jnp.maximum(xb @ w1b.T + b1, 0.0)           # (B, 101)
    y = jnp.maximum(h[:, :100] @ w2.T + b2, 0.0)    # (B, 1)
    return y


if __name__ == "__main__":
    B, n = 1024, 32
    key = jax.random.PRNGKey(0)
    kx, k1, k2, k3, k4 = jax.random.split(key, 5)

    x = jax.random.normal(kx, (B, n), jnp.float32)
    bound1 = 1.0 / float(jnp.sqrt(jnp.float32(n)))
    w1 = jax.random.uniform(k1, (101, n), jnp.float32, -bound1, bound1)
    b1 = jax.random.uniform(k2, (101,), jnp.float32, -bound1, bound1)
    bound2 = 1.0 / float(jnp.sqrt(jnp.float32(100.0)))
    w2 = jax.random.uniform(k3, (1, 100), jnp.float32, -bound2, bound2)
    b2 = jax.random.uniform(k4, (1,), jnp.float32, -bound2, bound2)

    params = prepare_params(w1, b1, w2, b2)   # one-time layout prep, hoisted out of forward
    out = net1_forward(x, *params)
    jax.block_until_ready(out)

    ref = net1_reference(x, w1, b1, w2, b2)
    assert out.shape == (B, 1)
    assert jnp.allclose(out, ref, atol=1e-3, rtol=1e-3), "mismatch vs reference"

    print("KERNEL_OK")
</pallas_src>

<mosaic_0001>
module attributes {stable_mosaic.version = 11 : i64} {
  func.func @net1_kernel(%arg0: i32, %arg1: memref<1024x32xf32, #tpu.memory_space<vmem>>, %arg2: memref<32x128xbf16, #tpu.memory_space<vmem>>, %arg3: memref<1x128xf32, #tpu.memory_space<vmem>>, %arg4: memref<1x128xf32, #tpu.memory_space<vmem>>, %arg5: memref<1x1xf32, #tpu.memory_space<smem>>, %arg6: memref<1024x1xf32, #tpu.memory_space<vmem>>) attributes {dimension_semantics = [#tpu.dimension_semantics<parallel>], iteration_bounds = array<i64: 1>, scalar_prefetch = 0 : i64, scratch_operands = 0 : i64, tpu.core_type = #tpu.core_type<tc>, window_params = [{transform_indices = @transform_0, window_bounds = array<i64: 1024, 32>}, {pipeline_mode = #tpu.pipeline_mode<synchronous>, transform_indices = @transform_1, window_bounds = array<i64: 32, 128>}, {pipeline_mode = #tpu.pipeline_mode<synchronous>, transform_indices = @transform_2, window_bounds = array<i64: 1, 128>}, {pipeline_mode = #tpu.pipeline_mode<synchronous>, transform_indices = @transform_3, window_bounds = array<i64: 1, 128>}, {transform_indices = @transform_4, window_bounds = array<i64: 1, 1>}, {transform_indices = @transform_5, window_bounds = array<i64: 1024, 1>}]} {
    %c0 = arith.constant 0 : index
    %c0_0 = arith.constant 0 : index
    %0 = vector.load %arg1[%c0, %c0_0] : memref<1024x32xf32, #tpu.memory_space<vmem>>, vector<1024x32xf32>
    %1 = arith.truncf %0 : vector<1024x32xf32> to vector<1024x32xbf16>
    %c0_1 = arith.constant 0 : index
    %c0_2 = arith.constant 0 : index
    %2 = vector.load %arg2[%c0_1, %c0_2] : memref<32x128xbf16, #tpu.memory_space<vmem>>, vector<32x128xbf16>
    %cst = arith.constant dense<0.000000e+00> : vector<1024x128xf32>
    %3 = tpu.matmul %1, %2, %cst {dimension_numbers = #tpu.dot_dimension_numbers<[1], [0], [0], [1], [0, 0, 1, 1], [], []>} : vector<1024x32xbf16>, vector<32x128xbf16>, vector<1024x128xf32> -> vector<1024x128xf32>
    %c0_3 = arith.constant 0 : index
    %c0_4 = arith.constant 0 : index
    %4 = vector.load %arg3[%c0_3, %c0_4] : memref<1x128xf32, #tpu.memory_space<vmem>>, vector<1x128xf32>
    %5 = vector.broadcast %4 : vector<1x128xf32> to vector<1024x128xf32>
    %6 = arith.addf %3, %5 : vector<1024x128xf32>
    %cst_5 = arith.constant 0.000000e+00 : f32
    %7 = vector.broadcast %cst_5 : f32 to vector<1024x128xf32>
    %8 = arith.maximumf %6, %7 : vector<1024x128xf32>
    %c0_6 = arith.constant 0 : index
    %c0_7 = arith.constant 0 : index
    %9 = vector.load %arg4[%c0_6, %c0_7] : memref<1x128xf32, #tpu.memory_space<vmem>>, vector<1x128xf32>
    %10 = vector.broadcast %9 : vector<1x128xf32> to vector<1024x128xf32>
    %11 = arith.mulf %8, %10 : vector<1024x128xf32>
    %cst_8 = arith.constant dense<0.000000e+00> : vector<1024xf32>
    %12 = vector.multi_reduction <add>, %11, %cst_8 [1] : vector<1024x128xf32> to vector<1024xf32>
    %13 = vector.shape_cast %12 : vector<1024xf32> to vector<1024x1xf32>
    %c0_9 = arith.constant 0 : index
    %c0_10 = arith.constant 0 : index
    %14 = memref.load %arg5[%c0_9, %c0_10] : memref<1x1xf32, #tpu.memory_space<smem>>
    %15 = vector.broadcast %14 : f32 to vector<1024x1xf32>
    %16 = arith.addf %13, %15 : vector<1024x1xf32>
    %cst_11 = arith.constant 0.000000e+00 : f32
    %17 = vector.broadcast %cst_11 : f32 to vector<1024x1xf32>
    %18 = arith.maximumf %16, %17 : vector<1024x1xf32>
    %c0_12 = arith.constant 0 : index
    %c0_13 = arith.constant 0 : index
    %19 = vector.load %arg6[%c0_12, %c0_13] : memref<1024x1xf32, #tpu.memory_space<vmem>>, vector<1024x1xf32>
    tpu.vector_store %arg6[%c0_12, %c0_13], %18 {strides = array<i32>} : memref<1024x1xf32, #tpu.memory_space<vmem>>, vector<1024x1xf32>,
    return
  }
  func.func @transform_0(%arg0: i32) -> (i32, i32) {
    %c0_i32 = arith.constant 0 : i32
    %c0_i32_0 = arith.constant 0 : i32
    return %arg0, %c0_i32 : i32, i32
  }
  func.func @transform_1(%arg0: i32) -> (i32, i32) {
    %c0_i32 = arith.constant 0 : i32
    %c0_i32_0 = arith.constant 0 : i32
    %c0_i32_1 = arith.constant 0 : i32
    return %c0_i32, %c0_i32_0 : i32, i32
  }
  func.func @transform_2(%arg0: i32) -> (i32, i32) {
    %c0_i32 = arith.constant 0 : i32
    %c0_i32_0 = arith.constant 0 : i32
    %c0_i32_1 = arith.constant 0 : i32
    return %c0_i32, %c0_i32_0 : i32, i32
  }
  func.func @transform_3(%arg0: i32) -> (i32, i32) {
    %c0_i32 = arith.constant 0 : i32
    %c0_i32_0 = arith.constant 0 : i32
    %c0_i32_1 = arith.constant 0 : i32
    return %c0_i32, %c0_i32_0 : i32, i32
  }
  func.func @transform_4(%arg0: i32) -> (i32, i32) {
    %c0_i32 = arith.constant 0 : i32
    %c0_i32_0 = arith.constant 0 : i32
    %c0_i32_1 = arith.constant 0 : i32
    return %c0_i32, %c0_i32_0 : i32, i32
  }
  func.func @transform_5(%arg0: i32) -> (i32, i32) {
    %c0_i32 = arith.constant 0 : i32
    %c0_i32_0 = arith.constant 0 : i32
    return %arg0, %c0_i32 : i32, i32
  }
}

</mosaic_0001>

<bundles_post_ra>
// kernel: net1_forward.1
= control target key start
LH: loop header
LB: loop body
LE: loop exit
PB: predicated region body
PF: predicated region fallthrough
CT: control target
= control target key end

     0   :  { %vm237_vm0 = vcmask 261120   ;;  %vm1752_vm1 = vcmask 7168   ;;  %s3567_s1 = inlined_call_operand.vmem [shape: bf16[32,128], index: 1, kind: input, shape index: {}]   ;;  %s3568_s0 = inlined_call_operand.vmem [shape: f32[1024,32], index: 0, kind: input, shape index: {}]   ;;  %s3569_s2 = inlined_call_operand.vmem [shape: f32[1,128], index: 2, kind: input, shape index: {}]   ;;  %s3570_s3 = inlined_call_operand.vmem [shape: f32[1,128], index: 3, kind: input, shape index: {}]   ;;  %s3571_s4 = inlined_call_operand.<no memory space> [shape: f32[1,1], index: 4, kind: input, shape index: {}]   ;;  %s3572_s5 = inlined_call_operand.vmem [shape: f32[1024,1], index: 5, kind: output, shape index: {}]  }
   0x1   :  { %v2155_v0 = vld [vmem:[%s3567_s1 + $0x8] sm:$0xff]   ;;  %v2156_v1 = vld [vmem:[%s3567_s1] sm:$0xff]   ;;  %v24_v7 = vld [vmem:[%s3568_s0 + $0x10] sm:$0xff] }
   0x2   :  { %2019 = vmatprep.subr.bf16.mxu0 %v2155_v0  ;;  %2151 = vmatprep.subr.bf16.mxu1 %v2155_v0  ;;  %v22_v2 = vld [vmem:[%s3568_s0] sm:$0xff]  ;;  %v23_v3 = vld [vmem:[%s3568_s0 + $0x8] sm:$0xff]  ;;  %v25_v8 = vld [vmem:[%s3568_s0 + $0x18] sm:$0xff] }
   0x3   :  { %v86_v4 = vld [vmem:[%s3568_s0 + $0x200] sm:$0xff]  ;;  %2020 = vmatpush3.bf16.msra.mxu0 %v2155_v0  ;;  %2153 = vmatpush3.bf16.msra.mxu1 %v2155_v0  ;;  %v150_v5 = vpack.c.bf16 %v23_v3, %v22_v2  ;;  %v87_v6 = vld [vmem:[%s3568_s0 + $0x208] sm:$0xff]  ;;  %v88_v10 = vld [vmem:[%s3568_s0 + $0x210] sm:$0xff]  ;;  %v151_v14 = vpack.c.bf16 %v25_v8, %v24_v7 }
   0x4   :  { %2021 = vmatprep.subr.bf16.mxu0 %v2156_v1  ;;  %2152 = vmatprep.subr.bf16.mxu1 %v2156_v1  ;;  %v182_v9 = vpack.c.bf16 %v87_v6, %v86_v4  ;;  %v89_v11 = vld [vmem:[%s3568_s0 + $0x218] sm:$0xff]  ;;  %v26_v12 = vld [vmem:[%s3568_s0 + $0x20] sm:$0xff]  ;;  %v27_v13 = vld [vmem:[%s3568_s0 + $0x28] sm:$0xff] }
   0x5   :  { %2023 = vmatprep.mubr.msk.bf16.mxu0 %vm237_vm0, %v150_v5  ;;  %v183_v15 = vpack.c.bf16 %v89_v11, %v88_v10  ;;  %v90_v16 = vld [vmem:[%s3568_s0 + $0x220] sm:$0xff]  ;;  %v91_v17 = vld [vmem:[%s3568_s0 + $0x228] sm:$0xff]  ;;  %v152_v18 = vpack.c.bf16 %v27_v13, %v26_v12  ;;  %v28_v20 = vld [vmem:[%s3568_s0 + $0x30] sm:$0xff] }
   0x6   :  { %2087 = vmatprep.mubr.msk.bf16.mxu1 %vm237_vm0, %v182_v9  ;;  %v184_v19 = vpack.c.bf16 %v91_v17, %v90_v16  ;;  %v29_v21 = vld [vmem:[%s3568_s0 + $0x38] sm:$0xff]  ;;  %v92_v22 = vld [vmem:[%s3568_s0 + $0x230] sm:$0xff]  ;;  %v30_v24 = vld [vmem:[%s3568_s0 + $0x40] sm:$0xff] }
   0x7   :  { %2022 = vmatpush3.bf16.msra.mxu0 %v2156_v1  ;;  %2154 = vmatpush3.bf16.msra.mxu1 %v2156_v1  ;;  %v93_v23 = vld [vmem:[%s3568_s0 + $0x238] sm:$0xff]  ;;  %v31_v25 = vld [vmem:[%s3568_s0 + $0x48] sm:$0xff]  ;;  %v94_v26 = vld [vmem:[%s3568_s0 + $0x240] sm:$0xff]  ;;  %v153_v28 = vpack.c.bf16 %v29_v21, %v28_v20 }
   0x8   :  { %v95_v27 = vld [vmem:[%s3568_s0 + $0x248] sm:$0xff]  ;;  %v185_v29 = vpack.c.bf16 %v93_v23, %v92_v22  ;;  %v154_v30 = vpack.c.bf16 %v31_v25, %v30_v24  ;;  %v32_v32 = vld [vmem:[%s3568_s0 + $0x50] sm:$0xff]  ;;  %v33_v33 = vld [vmem:[%s3568_s0 + $0x58] sm:$0xff] }
   0x9   :  { %v186_v31 = vpack.c.bf16 %v95_v27, %v94_v26  ;;  %v96_v34 = vld [vmem:[%s3568_s0 + $0x250] sm:$0xff]  ;;  %v97_v35 = vld [vmem:[%s3568_s0 + $0x258] sm:$0xff]  ;;  %v34_v36 = vld [vmem:[%s3568_s0 + $0x60] sm:$0xff]  ;;  %v155_v40 = vpack.c.bf16 %v33_v33, %v32_v32 }
   0xa   :  { %2024 = vmatmul.mubr.msk.bf16.vlgmr.msra.gmra.mxu0 %vm237_vm0, %v151_v14  ;;  %2088 = vmatmul.mubr.msk.bf16.vlgmr.msra.gmra.mxu1 %vm237_vm0, %v183_v15  ;;  %v35_v37 = vld [vmem:[%s3568_s0 + $0x68] sm:$0xff]  ;;  %v98_v38 = vld [vmem:[%s3568_s0 + $0x260] sm:$0xff]  ;;  %v187_v41 = vpack.c.bf16 %v97_v35, %v96_v34  ;;  %v36_v44 = vld [vmem:[%s3568_s0 + $0x70] sm:$0xff] }
   0xb   :  { %2027 = vmatprep.mubr.msk.bf16.mxu0 %vm237_vm0, %v152_v18  ;;  %2091 = vmatprep.mubr.msk.bf16.mxu1 %vm237_vm0, %v184_v19  ;;  %v99_v39 = vld [vmem:[%s3568_s0 + $0x268] sm:$0xff]  ;;  %v156_v42 = vpack.c.bf16 %v35_v37, %v34_v36  ;;  %v37_v45 = vld [vmem:[%s3568_s0 + $0x78] sm:$0xff]  ;;  %v100_v46 = vld [vmem:[%s3568_s0 + $0x270] sm:$0xff] }
   0xc   :  { %v188_v43 = vpack.c.bf16 %v99_v39, %v98_v38  ;;  %v101_v47 = vld [vmem:[%s3568_s0 + $0x278] sm:$0xff]  ;;  %v38_v48 = vld [vmem:[%s3568_s0 + $0x80] sm:$0xff]  ;;  %v39_v49 = vld [vmem:[%s3568_s0 + $0x88] sm:$0xff]  ;;  %v157_v52 = vpack.c.bf16 %v37_v45, %v36_v44 }
   0xd   :  { %v102_v50 = vld [vmem:[%s3568_s0 + $0x280] sm:$0xff]  ;;  %v103_v51 = vld [vmem:[%s3568_s0 + $0x288] sm:$0xff]  ;;  %v189_v53 = vpack.c.bf16 %v101_v47, %v100_v46  ;;  %v158_v54 = vpack.c.bf16 %v39_v49, %v38_v48  ;;  %v40_v56 = vld [vmem:[%s3568_s0 + $0x90] sm:$0xff] }
   0xe   :  { %v190_v55 = vpack.c.bf16 %v103_v51, %v102_v50  ;;  %v41_v57 = vld [vmem:[%s3568_s0 + $0x98] sm:$0xff]  ;;  %v104_v58 = vld [vmem:[%s3568_s0 + $0x290] sm:$0xff]  ;;  %v42_v60 = vld [vmem:[%s3568_s0 + $0xa0] sm:$0xff] }
   0xf   :  { %v105_v59 = vld [vmem:[%s3568_s0 + $0x298] sm:$0xff]  ;;  %v43_v61 = vld [vmem:[%s3568_s0 + $0xa8] sm:$0xff]  ;;  %v106_v62 = vld [vmem:[%s3568_s0 + $0x2a0] sm:$0xff]  ;;  %v159_v0 = vpack.c.bf16 %v41_v57, %v40_v56 }
  0x10   :  { %v107_v63 = vld [vmem:[%s3568_s0 + $0x2a8] sm:$0xff]  ;;  %v191_v1 = vpack.c.bf16 %v105_v59, %v104_v58  ;;  %v160_v2 = vpack.c.bf16 %v43_v61, %v42_v60  ;;  %v44_v4 = vld [vmem:[%s3568_s0 + $0xb0] sm:$0xff]  ;;  %v45_v5 = vld [vmem:[%s3568_s0 + $0xb8] sm:$0xff] }
  0x11   :  { %v192_v3 = vpack.c.bf16 %v107_v63, %v106_v62  ;;  %v108_v6 = vld [vmem:[%s3568_s0 + $0x2b0] sm:$0xff]  ;;  %v109_v7 = vld [vmem:[%s3568_s0 + $0x2b8] sm:$0xff]  ;;  %v46_v8 = vld [vmem:[%s3568_s0 + $0xc0] sm:$0xff]  ;;  %v161_v12 = vpack.c.bf16 %v45_v5, %v44_v4 }
  0x12   :  { %2028 = vmatmul.mubr.msk.bf16.gmra.mxu0 %vm237_vm0, %v153_v28  ;;  %2092 = vmatmul.mubr.msk.bf16.gmra.mxu1 %vm237_vm0, %v185_v29  ;;  %v47_v9 = vld [vmem:[%s3568_s0 + $0xc8] sm:$0xff]  ;;  %v110_v10 = vld [vmem:[%s3568_s0 + $0x2c0] sm:$0xff]  ;;  %v193_v13 = vpack.c.bf16 %v109_v7, %v108_v6  ;;  %v48_v16 = vld [vmem:[%s3568_s0 + $0xd0] sm:$0xff] }
  0x13   :  { %2031 = vmatprep.mubr.msk.bf16.mxu0 %vm237_vm0, %v154_v30  ;;  %2095 = vmatprep.mubr.msk.bf16.mxu1 %vm237_vm0, %v186_v31  ;;  %v111_v11 = vld [vmem:[%s3568_s0 + $0x2c8] sm:$0xff]  ;;  %v162_v14 = vpack.c.bf16 %v47_v9, %v46_v8  ;;  %v49_v17 = vld [vmem:[%s3568_s0 + $0xd8] sm:$0xff]  ;;  %v112_v18 = vld [vmem:[%s3568_s0 + $0x2d0] sm:$0xff] }
  0x14   :  { %v194_v15 = vpack.c.bf16 %v111_v11, %v110_v10  ;;  %v113_v19 = vld [vmem:[%s3568_s0 + $0x2d8] sm:$0xff]  ;;  %v50_v20 = vld [vmem:[%s3568_s0 + $0xe0] sm:$0xff]  ;;  %v51_v21 = vld [vmem:[%s3568_s0 + $0xe8] sm:$0xff]  ;;  %v163_v24 = vpack.c.bf16 %v49_v17, %v48_v16 }
  0x15   :  { %v114_v22 = vld [vmem:[%s3568_s0 + $0x2e0] sm:$0xff]  ;;  %v115_v23 = vld [vmem:[%s3568_s0 + $0x2e8] sm:$0xff]  ;;  %v195_v25 = vpack.c.bf16 %v113_v19, %v112_v18  ;;  %v164_v26 = vpack.c.bf16 %v51_v21, %v50_v20  ;;  %v52_v28 = vld [vmem:[%s3568_s0 + $0xf0] sm:$0xff] }
  0x16   :  { %v196_v27 = vpack.c.bf16 %v115_v23, %v114_v22  ;;  %v53_v29 = vld [vmem:[%s3568_s0 + $0xf8] sm:$0xff]  ;;  %v116_v30 = vld [vmem:[%s3568_s0 + $0x2f0] sm:$0xff]  ;;  %v54_v32 = vld [vmem:[%s3568_s0 + $0x100] sm:$0xff] }
  0x17   :  { %v117_v31 = vld [vmem:[%s3568_s0 + $0x2f8] sm:$0xff]  ;;  %v55_v33 = vld [vmem:[%s3568_s0 + $0x108] sm:$0xff]  ;;  %v118_v34 = vld [vmem:[%s3568_s0 + $0x300] sm:$0xff]  ;;  %v165_v36 = vpack.c.bf16 %v53_v29, %v52_v28 }
  0x18   :  { %v119_v35 = vld [vmem:[%s3568_s0 + $0x308] sm:$0xff]  ;;  %v197_v37 = vpack.c.bf16 %v117_v31, %v116_v30  ;;  %v166_v38 = vpack.c.bf16 %v55_v33, %v54_v32  ;;  %v58_v44 = vld [vmem:[%s3568_s0 + $0x120] sm:$0xff] }
  0x19   :  { %v198_v39 = vpack.c.bf16 %v119_v35, %v118_v34  ;;  %v59_v45 = vld [vmem:[%s3568_s0 + $0x128] sm:$0xff]  ;;  %v122_v46 = vld [vmem:[%s3568_s0 + $0x320] sm:$0xff] }
  0x1a   :  { %2032 = vmatmul.mubr.msk.bf16.gmra.mxu0 %vm237_vm0, %v155_v40  ;;  %2096 = vmatmul.mubr.msk.bf16.gmra.mxu1 %vm237_vm0, %v187_v41  ;;  %v56_v40 = vld [vmem:[%s3568_s0 + $0x110] sm:$0xff]  ;;  %v57_v41 = vld [vmem:[%s3568_s0 + $0x118] sm:$0xff]  ;;  %v123_v47 = vld [vmem:[%s3568_s0 + $0x328] sm:$0xff]  ;;  %v168_v50 = vpack.c.bf16 %v59_v45, %v58_v44 }
  0x1b   :  { %2035 = vmatprep.mubr.msk.bf16.mxu0 %vm237_vm0, %v156_v42  ;;  %2099 = vmatprep.mubr.msk.bf16.mxu1 %vm237_vm0, %v188_v43  ;;  %v120_v42 = vld [vmem:[%s3568_s0 + $0x310] sm:$0xff]  ;;  %v121_v43 = vld [vmem:[%s3568_s0 + $0x318] sm:$0xff]  ;;  %v167_v48 = vpack.c.bf16 %v57_v41, %v56_v40  ;;  %v200_v51 = vpack.c.bf16 %v123_v47, %v122_v46  ;;  %v62_v56 = vld [vmem:[%s3568_s0 + $0x140] sm:$0xff] }
  0x1c   :  { %v199_v49 = vpack.c.bf16 %v121_v43, %v120_v42  ;;  %v63_v57 = vld [vmem:[%s3568_s0 + $0x148] sm:$0xff]  ;;  %v126_v58 = vld [vmem:[%s3568_s0 + $0x340] sm:$0xff] }
  0x1d   :  { %v127_v59 = vld [vmem:[%s3568_s0 + $0x348] sm:$0xff]  ;;  %v170_v62 = vpack.c.bf16 %v63_v57, %v62_v56  ;;  %v66_v4 = vld [vmem:[%s3568_s0 + $0x160] sm:$0xff] }
  0x1e   :  { %v202_v63 = vpack.c.bf16 %v127_v59, %v126_v58  ;;  %v67_v5 = vld [vmem:[%s3568_s0 + $0x168] sm:$0xff]  ;;  %v130_v6 = vld [vmem:[%s3568_s0 + $0x360] sm:$0xff] }
  0x1f   :  { %v131_v7 = vld [vmem:[%s3568_s0 + $0x368] sm:$0xff]  ;;  %v172_v10 = vpack.c.bf16 %v67_v5, %v66_v4  ;;  %v70_v16 = vld [vmem:[%s3568_s0 + $0x180] sm:$0xff] }
  0x20   :  { %v204_v11 = vpack.c.bf16 %v131_v7, %v130_v6  ;;  %v71_v17 = vld [vmem:[%s3568_s0 + $0x188] sm:$0xff]  ;;  %v134_v18 = vld [vmem:[%s3568_s0 + $0x380] sm:$0xff] }
  0x21   :  { %v135_v19 = vld [vmem:[%s3568_s0 + $0x388] sm:$0xff]  ;;  %v174_v22 = vpack.c.bf16 %v71_v17, %v70_v16  ;;  %v74_v28 = vld [vmem:[%s3568_s0 + $0x1a0] sm:$0xff] }
  0x22   :  { %2036 = vmatmul.mubr.msk.bf16.gmra.mxu0 %vm237_vm0, %v157_v52  ;;  %2100 = vmatmul.mubr.msk.bf16.gmra.mxu1 %vm237_vm0, %v189_v53  ;;  %v60_v52 = vld [vmem:[%s3568_s0 + $0x130] sm:$0xff]  ;;  %v61_v53 = vld [vmem:[%s3568_s0 + $0x138] sm:$0xff]  ;;  %v206_v23 = vpack.c.bf16 %v135_v19, %v134_v18  ;;  %v75_v29 = vld [vmem:[%s3568_s0 + $0x1a8] sm:$0xff] }
  0x23   :  { %2039 = vmatprep.mubr.msk.bf16.mxu0 %vm237_vm0, %v158_v54  ;;  %2103 = vmatprep.mubr.msk.bf16.mxu1 %vm237_vm0, %v190_v55  ;;  %v124_v54 = vld [vmem:[%s3568_s0 + $0x330] sm:$0xff]  ;;  %v125_v55 = vld [vmem:[%s3568_s0 + $0x338] sm:$0xff]  ;;  %v169_v60 = vpack.c.bf16 %v61_v53, %v60_v52  ;;  %v138_v30 = vld [vmem:[%s3568_s0 + $0x3a0] sm:$0xff]  ;;  %v176_v34 = vpack.c.bf16 %v75_v29, %v74_v28 }
  0x24   :  { %v201_v61 = vpack.c.bf16 %v125_v55, %v124_v54  ;;  %v139_v31 = vld [vmem:[%s3568_s0 + $0x3a8] sm:$0xff]  ;;  %v78_v40 = vld [vmem:[%s3568_s0 + $0x1c0] sm:$0xff] }
  0x25   :  { %v208_v35 = vpack.c.bf16 %v139_v31, %v138_v30  ;;  %v79_v41 = vld [vmem:[%s3568_s0 + $0x1c8] sm:$0xff]  ;;  %v142_v42 = vld [vmem:[%s3568_s0 + $0x3c0] sm:$0xff] }
  0x26   :  { %v143_v43 = vld [vmem:[%s3568_s0 + $0x3c8] sm:$0xff]  ;;  %v178_v46 = vpack.c.bf16 %v79_v41, %v78_v40  ;;  %v82_v52 = vld [vmem:[%s3568_s0 + $0x1e0] sm:$0xff] }
  0x27   :  { %v210_v47 = vpack.c.bf16 %v143_v43, %v142_v42  ;;  %v83_v53 = vld [vmem:[%s3568_s0 + $0x1e8] sm:$0xff]  ;;  %v146_v54 = vld [vmem:[%s3568_s0 + $0x3e0] sm:$0xff] }
  0x28   :  { %v147_v55 = vld [vmem:[%s3568_s0 + $0x3e8] sm:$0xff]  ;;  %v180_v58 = vpack.c.bf16 %v83_v53, %v82_v52 }
  0x29   :  { %v212_v59 = vpack.c.bf16 %v147_v55, %v146_v54 }
  0x2a   :  { %2040 = vmatmul.mubr.msk.bf16.gmra.mxu0 %vm237_vm0, %v159_v0  ;;  %2104 = vmatmul.mubr.msk.bf16.gmra.mxu1 %vm237_vm0, %v191_v1  ;;  %v64_v0 = vld [vmem:[%s3568_s0 + $0x150] sm:$0xff]  ;;  %v65_v1 = vld [vmem:[%s3568_s0 + $0x158] sm:$0xff] }
  0x2b   :  { %2043 = vmatprep.mubr.msk.bf16.mxu0 %vm237_vm0, %v160_v2  ;;  %2107 = vmatprep.mubr.msk.bf16.mxu1 %vm237_vm0, %v192_v3  ;;  %v128_v2 = vld [vmem:[%s3568_s0 + $0x350] sm:$0xff]  ;;  %v129_v3 = vld [vmem:[%s3568_s0 + $0x358] sm:$0xff]  ;;  %v171_v8 = vpack.c.bf16 %v65_v1, %v64_v0 }
  0x2c   :  { %v203_v9 = vpack.c.bf16 %v129_v3, %v128_v2  ;;  %v2646_v2 = vld [vmem:[%s3569_s2] ss:$0 sm:$0xff] }
  0x32   :  { %2044 = vmatmul.mubr.msk.bf16.gmra.mxu0 %vm237_vm0, %v161_v12  ;;  %2108 = vmatmul.mubr.msk.bf16.gmra.mxu1 %vm237_vm0, %v193_v13  ;;  %v68_v12 = vld [vmem:[%s3568_s0 + $0x170] sm:$0xff]  ;;  %v69_v13 = vld [vmem:[%s3568_s0 + $0x178] sm:$0xff] }
  0x33   :  { %2047 = vmatprep.mubr.msk.bf16.mxu0 %vm237_vm0, %v162_v14  ;;  %2111 = vmatprep.mubr.msk.bf16.mxu1 %vm237_vm0, %v194_v15  ;;  %v132_v14 = vld [vmem:[%s3568_s0 + $0x370] sm:$0xff]  ;;  %v133_v15 = vld [vmem:[%s3568_s0 + $0x378] sm:$0xff]  ;;  %v173_v20 = vpack.c.bf16 %v69_v13, %v68_v12  ;;  %v2654_v12 = vld [vmem:[%s3570_s3] ss:$0 sm:$0xff] }
  0x34   :  { %v205_v21 = vpack.c.bf16 %v133_v15, %v132_v14 }
  0x3a   :  { %2048 = vmatmul.mubr.msk.bf16.gmra.mxu0 %vm237_vm0, %v163_v24  ;;  %2112 = vmatmul.mubr.msk.bf16.gmra.mxu1 %vm237_vm0, %v195_v25  ;;  %v72_v24 = vld [vmem:[%s3568_s0 + $0x190] sm:$0xff]  ;;  %v73_v25 = vld [vmem:[%s3568_s0 + $0x198] sm:$0xff] }
  0x3b   :  { %2051 = vmatprep.mubr.msk.bf16.mxu0 %vm237_vm0, %v164_v26  ;;  %2115 = vmatprep.mubr.msk.bf16.mxu1 %vm237_vm0, %v196_v27  ;;  %v136_v26 = vld [vmem:[%s3568_s0 + $0x390] sm:$0xff]  ;;  %v137_v27 = vld [vmem:[%s3568_s0 + $0x398] sm:$0xff]  ;;  %v175_v32 = vpack.c.bf16 %v73_v25, %v72_v24 }
  0x3c   :  { %v207_v33 = vpack.c.bf16 %v137_v27, %v136_v26 }
  0x42   :  { %2052 = vmatmul.mubr.msk.bf16.gmra.mxu0 %vm237_vm0, %v165_v36  ;;  %2116 = vmatmul.mubr.msk.bf16.gmra.mxu1 %vm237_vm0, %v197_v37  ;;  %v76_v36 = vld [vmem:[%s3568_s0 + $0x1b0] sm:$0xff]  ;;  %v77_v37 = vld [vmem:[%s3568_s0 + $0x1b8] sm:$0xff] }
  0x43   :  { %2055 = vmatprep.mubr.msk.bf16.mxu0 %vm237_vm0, %v166_v38  ;;  %2119 = vmatprep.mubr.msk.bf16.mxu1 %vm237_vm0, %v198_v39  ;;  %v140_v38 = vld [vmem:[%s3568_s0 + $0x3b0] sm:$0xff]  ;;  %v141_v39 = vld [vmem:[%s3568_s0 + $0x3b8] sm:$0xff]  ;;  %v177_v44 = vpack.c.bf16 %v77_v37, %v76_v36 }
  0x44   :  { %v209_v45 = vpack.c.bf16 %v141_v39, %v140_v38 }
  0x4a   :  { %2056 = vmatmul.mubr.msk.bf16.gmra.mxu0 %vm237_vm0, %v167_v48  ;;  %2120 = vmatmul.mubr.msk.bf16.gmra.mxu1 %vm237_vm0, %v199_v49  ;;  %v80_v48 = vld [vmem:[%s3568_s0 + $0x1d0] sm:$0xff]  ;;  %v81_v49 = vld [vmem:[%s3568_s0 + $0x1d8] sm:$0xff] }
  0x4b   :  { %2059 = vmatprep.mubr.msk.bf16.mxu0 %vm237_vm0, %v168_v50  ;;  %2123 = vmatprep.mubr.msk.bf16.mxu1 %vm237_vm0, %v200_v51  ;;  %v144_v50 = vld [vmem:[%s3568_s0 + $0x3d0] sm:$0xff]  ;;  %v145_v51 = vld [vmem:[%s3568_s0 + $0x3d8] sm:$0xff]  ;;  %v179_v56 = vpack.c.bf16 %v81_v49, %v80_v48 }
  0x4c   :  { %v211_v57 = vpack.c.bf16 %v145_v51, %v144_v50 }
  0x52   :  { %2060 = vmatmul.mubr.msk.bf16.gmra.mxu0 %vm237_vm0, %v169_v60  ;;  %2124 = vmatmul.mubr.msk.bf16.gmra.mxu1 %vm237_vm0, %v201_v61  ;;  %v84_v60 = vld [vmem:[%s3568_s0 + $0x1f0] sm:$0xff]  ;;  %v85_v61 = vld [vmem:[%s3568_s0 + $0x1f8] sm:$0xff] }
  0x53   :  { %2063 = vmatprep.mubr.msk.bf16.mxu0 %vm237_vm0, %v170_v62  ;;  %2127 = vmatprep.mubr.msk.bf16.mxu1 %vm237_vm0, %v202_v63  ;;  %v148_v62 = vld [vmem:[%s3568_s0 + $0x3f0] sm:$0xff]  ;;  %v149_v63 = vld [vmem:[%s3568_s0 + $0x3f8] sm:$0xff]  ;;  %v181_v0 = vpack.c.bf16 %v85_v61, %v84_v60 }
  0x54   :  { %v213_v1 = vpack.c.bf16 %v149_v63, %v148_v62 }
  0x5a   :  { %2064 = vmatmul.mubr.msk.bf16.gmra.mxu0 %vm237_vm0, %v171_v8  ;;  %2128 = vmatmul.mubr.msk.bf16.gmra.mxu1 %vm237_vm0, %v203_v9 }
  0x5b   :  { %2067 = vmatprep.mubr.msk.bf16.mxu0 %vm237_vm0, %v172_v10  ;;  %2131 = vmatprep.mubr.msk.bf16.mxu1 %vm237_vm0, %v204_v11 }
  0x62   :  { %2068 = vmatmul.mubr.msk.bf16.gmra.mxu0 %vm237_vm0, %v173_v20  ;;  %2132 = vmatmul.mubr.msk.bf16.gmra.mxu1 %vm237_vm0, %v205_v21 }
  0x63   :  { %2071 = vmatprep.mubr.msk.bf16.mxu0 %vm237_vm0, %v174_v22  ;;  %2135 = vmatprep.mubr.msk.bf16.mxu1 %vm237_vm0, %v206_v23 }
  0x6a   :  { %2072 = vmatmul.mubr.msk.bf16.gmra.mxu0 %vm237_vm0, %v175_v32  ;;  %2136 = vmatmul.mubr.msk.bf16.gmra.mxu1 %vm237_vm0, %v207_v33 }
  0x6b   :  { %2075 = vmatprep.mubr.msk.bf16.mxu0 %vm237_vm0, %v176_v34  ;;  %2139 = vmatprep.mubr.msk.bf16.mxu1 %vm237_vm0, %v208_v35 }
  0x72   :  { %2076 = vmatmul.mubr.msk.bf16.gmra.mxu0 %vm237_vm0, %v177_v44  ;;  %2140 = vmatmul.mubr.msk.bf16.gmra.mxu1 %vm237_vm0, %v209_v45 }
  0x73   :  { %2079 = vmatprep.mubr.msk.bf16.mxu0 %vm237_vm0, %v178_v46  ;;  %2143 = vmatprep.mubr.msk.bf16.mxu1 %vm237_vm0, %v210_v47 }
  0x7a   :  { %2080 = vmatmul.mubr.msk.bf16.gmra.mxu0 %vm237_vm0, %v179_v56  ;;  %2144 = vmatmul.mubr.msk.bf16.gmra.mxu1 %vm237_vm0, %v211_v57 }
  0x7b   :  { %2083 = vmatprep.mubr.msk.bf16.mxu0 %vm237_vm0, %v180_v58  ;;  %2147 = vmatprep.mubr.msk.bf16.mxu1 %vm237_vm0, %v212_v59 }
  0x82   :  { %2084 = vmatmul.mubr.msk.bf16.gmra.mxu0 %vm237_vm0, %v181_v0  ;;  %2148 = vmatmul.mubr.msk.bf16.gmra.mxu1 %vm237_vm0, %v213_v1 }
  0xca   :  { %v2025_v3 = vpop.f32.mrf.mxu0  ;;  %v2089_v4 = vpop.f32.mrf.mxu1 }
  0xcb   :  { %v473_v5 = vadd.f32 %v2025_v3, %v2646_v2  ;;  %v729_v6 = vadd.f32 %v2089_v4, %v2646_v2 }
  0xcc   :  { %v464_v7 = vpop.f32.mrf.mxu0  ;;  %v720_v8 = vpop.f32.mrf.mxu1 }
  0xcd   :  { %v977_v9 = vmax.f32 %v473_v5, 0.0  ;;  %v1041_v10 = vmax.f32 %v729_v6, 0.0  ;;  %v465_v11 = vadd.f32 %v2646_v2, %v464_v7  ;;  %v721_v15 = vadd.f32 %v2646_v2, %v720_v8 }
  0xce   :  { %v2026_v13 = vpop.f32.mrf.mxu0  ;;  %v2090_v14 = vpop.f32.mrf.mxu1 }
  0xcf   :  { %v476_v16 = vadd.f32 %v2026_v13, %v2646_v2  ;;  %v732_v17 = vadd.f32 %v2090_v14, %v2646_v2  ;;  %v975_v18 = vmax.f32 %v465_v11, 0.0  ;;  %v1176_v20 = vmul.f32 %v2654_v12, %v1041_v10 }
  0xd0   :  { %v467_v19 = vpop.f32.mrf.mxu0  ;;  %v1112_v21 = vmul.f32 %v2654_v12, %v977_v9  ;;  %v723_v23 = vpop.f32.mrf.mxu1  ;;  %v1039_v25 = vmax.f32 %v721_v15, 0.0 }
  0xd1   :  { %v978_v22 = vmax.f32 %v476_v16, 0.0  ;;  %1370 = vadd.xlane.f32.xlu0 %v1176_v20  ;;  %v1042_v26 = vmax.f32 %v732_v17, 0.0  ;;  %v468_v28 = vadd.f32 %v2646_v2, %v467_v19  ;;  %v724_v29 = vadd.f32 %v2646_v2, %v723_v23 }
  0xd2   :  { %1242 = vadd.xlane.f32.xlu1 %v1112_v21  ;;  %v2029_v24 = vpop.f32.mrf.mxu0  ;;  %v2093_v27 = vpop.f32.mrf.mxu1  ;;  %v1110_v32 = vmul.f32 %v2654_v12, %v975_v18  ;;  %v1174_v36 = vmul.f32 %v2654_v12, %v1039_v25 }
  0xd3   :  { %v1113_v31 = vmul.f32 %v2654_v12, %v978_v22  ;;  %v489_v34 = vadd.f32 %v2029_v24, %v2646_v2  ;;  %v976_v37 = vmax.f32 %v468_v28, 0.0  ;;  %v1040_v38 = vmax.f32 %v724_v29, 0.0 }
  0xd4   :  { %v480_v30 = vpop.f32.mrf.mxu0  ;;  %v736_v35 = vpop.f32.mrf.mxu1  ;;  %v1177_v40 = vmul.f32 %v2654_v12, %v1042_v26  ;;  %v745_v42 = vadd.f32 %v2093_v27, %v2646_v2 }
  0xd5   :  { %1238 = vadd.xlane.f32.xlu0 %v1110_v32  ;;  %v981_v41 = vmax.f32 %v489_v34, 0.0  ;;  %v1175_v46 = vmul.f32 %v2654_v12, %v1040_v38  ;;  %v1111_v47 = vmul.f32 %v2654_v12, %v976_v37  ;;  %v481_v49 = vadd.f32 %v2646_v2, %v480_v30 }
  0xd6   :  { %1244 = vadd.xlane.f32.xlu1 %v1113_v31  ;;  %v2030_v33 = vpop.f32.mrf.mxu0  ;;  %v2094_v43 = vpop.f32.mrf.mxu1  ;;  %v1045_v50 = vmax.f32 %v745_v42, 0.0  ;;  %v737_v58 = vadd.f32 %v2646_v2, %v736_v35 }
  0xd7   :  { %v492_v39 = vadd.f32 %v2030_v33, %v2646_v2  ;;  %v748_v45 = vadd.f32 %v2094_v43, %v2646_v2  ;;  %v1116_v55 = vmul.f32 %v2654_v12, %v981_v41  ;;  %v979_v57 = vmax.f32 %v481_v49, 0.0 }
  0xd8   :  { %v483_v48 = vpop.f32.mrf.mxu0  ;;  %v739_v56 = vpop.f32.mrf.mxu1  ;;  %v1180_v0 = vmul.f32 %v2654_v12, %v1045_v50  ;;  %v1043_v1 = vmax.f32 %v737_v58, 0.0 }
  0xd9   :  { %1366 = vadd.xlane.f32.xlu0 %v1174_v36  ;;  %v982_v44 = vmax.f32 %v492_v39, 0.0  ;;  %v484_v52 = vadd.f32 %v2646_v2, %v483_v48  ;;  %v1046_v53 = vmax.f32 %v748_v45, 0.0  ;;  %v740_v62 = vadd.f32 %v2646_v2, %v739_v56 }
  0xda   :  { %1372 = vadd.xlane.f32.xlu1 %v1177_v40  ;;  %v2033_v51 = vpop.f32.mrf.mxu0  ;;  %v2097_v60 = vpop.f32.mrf.mxu1  ;;  %v1114_v5 = vmul.f32 %v2654_v12, %v979_v57  ;;  %v1178_v13 = vmul.f32 %v2654_v12, %v1043_v1 }
  0xdb   :  { %v1117_v54 = vmul.f32 %v2654_v12, %v982_v44  ;;  %v980_v61 = vmax.f32 %v484_v52, 0.0  ;;  %v1181_v63 = vmul.f32 %v2654_v12, %v1046_v53  ;;  %v1044_v6 = vmax.f32 %v740_v62, 0.0 }
  0xdc   :  { %v496_v59 = vpop.f32.mrf.mxu0  ;;  %v752_v4 = vpop.f32.mrf.mxu1  ;;  %v505_v7 = vadd.f32 %v2033_v51, %v2646_v2  ;;  %v761_v10 = vadd.f32 %v2097_v60, %v2646_v2 }
  0xdd   :  { %1240 = vadd.xlane.f32.xlu0 %v1111_v47  ;;  %v1115_v9 = vmul.f32 %v2654_v12, %v980_v61  ;;  %v1179_v17 = vmul.f32 %v2654_v12, %v1044_v6  ;;  %v497_v19 = vadd.f32 %v2646_v2, %v496_v59  ;;  %v753_v28 = vadd.f32 %v2646_v2, %v752_v4 }
  0xde   :  { %1368 = vadd.xlane.f32.xlu1 %v1175_v46  ;;  %v2034_v3 = vpop.f32.mrf.mxu0  ;;  %v2098_v11 = vpop.f32.mrf.mxu1  ;;  %v985_v14 = vmax.f32 %v505_v7, 0.0  ;;  %v1049_v20 = vmax.f32 %v761_v10, 0.0 }
  0xdf   :  { %v508_v8 = vadd.f32 %v2034_v3, %v2646_v2  ;;  %v764_v16 = vadd.f32 %v2098_v11, %v2646_v2  ;;  %v983_v27 = vmax.f32 %v497_v19, 0.0  ;;  %v1047_v35 = vmax.f32 %v753_v28, 0.0 }
  0xe0   :  { %v499_v18 = vpop.f32.mrf.mxu0  ;;  %v1120_v25 = vmul.f32 %v2654_v12, %v985_v14  ;;  %v755_v26 = vpop.f32.mrf.mxu1  ;;  %v1184_v34 = vmul.f32 %v2654_v12, %v1049_v20 }
  0xe1   :  { %1250 = vadd.xlane.f32.xlu0 %v1116_v55  ;;  %v986_v15 = vmax.f32 %v508_v8, 0.0  ;;  %v500_v22 = vadd.f32 %v2646_v2, %v499_v18  ;;  %v1050_v23 = vmax.f32 %v764_v16, 0.0  ;;  %v756_v32 = vadd.f32 %v2646_v2, %v755_v26 }
  0xe2   :  { %1252 = vadd.xlane.f32.xlu1 %v1117_v54  ;;  %v2037_v21 = vpop.f32.mrf.mxu0  ;;  %v2101_v30 = vpop.f32.mrf.mxu1  ;;  %v1118_v38 = vmul.f32 %v2654_v12, %v983_v27  ;;  %v1182_v45 = vmul.f32 %v2654_v12, %v1047_v35 }
  0xe3   :  { %v1121_v24 = vmul.f32 %v2654_v12, %v986_v15  ;;  %v984_v31 = vmax.f32 %v500_v22, 0.0  ;;  %v1185_v33 = vmul.f32 %v2654_v12, %v1050_v23  ;;  %v1048_v39 = vmax.f32 %v756_v32, 0.0 }
  0xe4   :  { %v512_v29 = vpop.f32.mrf.mxu0  ;;  %v768_v37 = vpop.f32.mrf.mxu1  ;;  %v521_v40 = vadd.f32 %v2037_v21, %v2646_v2  ;;  %v777_v43 = vadd.f32 %v2101_v30, %v2646_v2 }
  0xe5   :  { %1378 = vadd.xlane.f32.xlu0 %v1180_v0  ;;  %v1119_v42 = vmul.f32 %v2654_v12, %v984_v31  ;;  %v1183_v49 = vmul.f32 %v2654_v12, %v1048_v39  ;;  %v513_v51 = vadd.f32 %v2646_v2, %v512_v29  ;;  %v769_v60 = vadd.f32 %v2646_v2, %v768_v37 }
  0xe6   :  { %1380 = vadd.xlane.f32.xlu1 %v1181_v63  ;;  %v2038_v36 = vpop.f32.mrf.mxu0  ;;  %v2102_v44 = vpop.f32.mrf.mxu1  ;;  %v989_v46 = vmax.f32 %v521_v40, 0.0  ;;  %v1053_v52 = vmax.f32 %v777_v43, 0.0 }
  0xe7   :  { %v524_v41 = vadd.f32 %v2038_v36, %v2646_v2  ;;  %v780_v48 = vadd.f32 %v2102_v44, %v2646_v2  ;;  %v987_v59 = vmax.f32 %v513_v51, 0.0  ;;  %v1051_v4 = vmax.f32 %v769_v60, 0.0 }
  0xe8   :  { %v515_v50 = vpop.f32.mrf.mxu0  ;;  %v1124_v57 = vmul.f32 %v2654_v12, %v989_v46  ;;  %v771_v58 = vpop.f32.mrf.mxu1  ;;  %v1188_v3 = vmul.f32 %v2654_v12, %v1053_v52 }
  0xe9   :  { %1246 = vadd.xlane.f32.xlu0 %v1114_v5  ;;  %v990_v47 = vmax.f32 %v524_v41, 0.0  ;;  %v516_v54 = vadd.f32 %v2646_v2, %v515_v50  ;;  %v1054_v55 = vmax.f32 %v780_v48, 0.0  ;;  %v772_v0 = vadd.f32 %v2646_v2, %v771_v58 }
  0xea   :  { %1248 = vadd.xlane.f32.xlu1 %v1115_v9  ;;  %v2041_v53 = vpop.f32.mrf.mxu0  ;;  %v2105_v62 = vpop.f32.mrf.mxu1  ;;  %v1122_v7 = vmul.f32 %v2654_v12, %v987_v59  ;;  %v1186_v15 = vmul.f32 %v2654_v12, %v1051_v4 }
  0xeb   :  { %v1125_v56 = vmul.f32 %v2654_v12, %v990_v47  ;;  %v988_v63 = vmax.f32 %v516_v54, 0.0  ;;  %v1189_v1 = vmul.f32 %v2654_v12, %v1054_v55  ;;  %v1052_v8 = vmax.f32 %v772_v0, 0.0 }
  0xec   :  { %v528_v61 = vpop.f32.mrf.mxu0  ;;  %v784_v6 = vpop.f32.mrf.mxu1  ;;  %v537_v9 = vadd.f32 %v2041_v53, %v2646_v2 }
  0xed   :  { %1374 = vadd.xlane.f32.xlu0 %v1178_v13  ;;  %v1123_v11 = vmul.f32 %v2654_v12, %v988_v63  ;;  %v793_v13 = vadd.f32 %v2105_v62, %v2646_v2  ;;  %v1187_v19 = vmul.f32 %v2654_v12, %v1052_v8  ;;  %v529_v21 = vadd.f32 %v2646_v2, %v528_v61 }
  0xee   :  { %1376 = vadd.xlane.f32.xlu1 %v1179_v17  ;;  %v2042_v5 = vpop.f32.mrf.mxu0  ;;  %v2106_v14 = vpop.f32.mrf.mxu1  ;;  %v993_v16 = vmax.f32 %v537_v9, 0.0  ;;  %v785_v30 = vadd.f32 %v2646_v2, %v784_v6 }
  0xef   :  { %v540_v10 = vadd.f32 %v2042_v5, %v2646_v2  ;;  %v796_v18 = vadd.f32 %v2106_v14, %v2646_v2  ;;  %v1057_v22 = vmax.f32 %v793_v13, 0.0  ;;  %v991_v29 = vmax.f32 %v529_v21, 0.0 }
  0xf0   :  { %v531_v20 = vpop.f32.mrf.mxu0  ;;  %v1128_v27 = vmul.f32 %v2654_v12, %v993_v16  ;;  %v787_v28 = vpop.f32.mrf.mxu1  ;;  %v1055_v37 = vmax.f32 %v785_v30, 0.0 }
  0xf1   :  { %1258 = vadd.xlane.f32.xlu0 %v1120_v25  ;;  %v994_v17 = vmax.f32 %v540_v10, 0.0  ;;  %v1058_v25 = vmax.f32 %v796_v18, 0.0  ;;  %v1192_v36 = vmul.f32 %v2654_v12, %v1057_v22  ;;  %v1126_v40 = vmul.f32 %v2654_v12, %v991_v29 }
  0xf2   :  { %1260 = vadd.xlane.f32.xlu1 %v1121_v24  ;;  %v2045_v23 = vpop.f32.mrf.mxu0  ;;  %v532_v24 = vadd.f32 %v2646_v2, %v531_v20  ;;  %v2109_v32 = vpop.f32.mrf.mxu1  ;;  %v1190_v47 = vmul.f32 %v2654_v12, %v1055_v37 }
  0xf3   :  { %v1129_v26 = vmul.f32 %v2654_v12, %v994_v17  ;;  %v1193_v35 = vmul.f32 %v2654_v12, %v1058_v25 }
  0xf4   :  { %v544_v31 = vpop.f32.mrf.mxu0  ;;  %v800_v39 = vpop.f32.mrf.mxu1 }
  0xf5   :  { %1386 = vadd.xlane.f32.xlu0 %v1184_v34  ;;  %v788_v34 = vadd.f32 %v2646_v2, %v787_v28  ;;  %v545_v53 = vadd.f32 %v2646_v2, %v544_v31  ;;  %v801_v62 = vadd.f32 %v2646_v2, %v800_v39 }
  0xf6   :  { %1388 = vadd.xlane.f32.xlu1 %v1185_v33  ;;  %v992_v33 = vmax.f32 %v532_v24, 0.0  ;;  %v2110_v46 = vpop.f32.mrf.mxu1 }
  0xf7   :  { %v1056_v41 = vmax.f32 %v788_v34, 0.0  ;;  %v812_v50 = vadd.f32 %v2110_v46, %v2646_v2  ;;  %v995_v61 = vmax.f32 %v545_v53, 0.0  ;;  %v1059_v6 = vmax.f32 %v801_v62, 0.0 }
  0xf8   :  { %v1127_v44 = vmul.f32 %v2654_v12, %v992_v33  ;;  %v803_v60 = vpop.f32.mrf.mxu1 }
  0xf9   :  { %1254 = vadd.xlane.f32.xlu0 %v1118_v38  ;;  %v2046_v38 = vpop.f32.mrf.mxu0  ;;  %v1191_v51 = vmul.f32 %v2654_v12, %v1056_v41  ;;  %v1130_v9 = vmul.f32 %v2654_v12, %v995_v61  ;;  %v1194_v17 = vmul.f32 %v2654_v12, %v1059_v6 }
  0xfa   :  { %1256 = vadd.xlane.f32.xlu1 %v1119_v42  ;;  %v553_v42 = vadd.f32 %v2045_v23, %v2646_v2  ;;  %v556_v43 = vadd.f32 %v2046_v38, %v2646_v2  ;;  %v2113_v0 = vpop.f32.mrf.mxu1 }
  0xfb   :  { %v547_v52 = vpop.f32.mrf.mxu0 }
  0xfc   :  { %v997_v48 = vmax.f32 %v553_v42, 0.0  ;;  %v816_v8 = vpop.f32.mrf.mxu1 }
  0xfd   :  { %1382 = vadd.xlane.f32.xlu0 %v1182_v45  ;;  %v809_v45 = vadd.f32 %v2109_v32, %v2646_v2  ;;  %v2049_v55 = vpop.f32.mrf.mxu0  ;;  %v817_v32 = vadd.f32 %v2646_v2, %v816_v8 }
  0xfe   :  { %1384 = vadd.xlane.f32.xlu1 %v1183_v49  ;;  %v998_v49 = vmax.f32 %v556_v43, 0.0  ;;  %v1132_v59 = vmul.f32 %v2654_v12, %v997_v48  ;;  %v2114_v16 = vpop.f32.mrf.mxu1 }
  0xff   :  { %v1061_v54 = vmax.f32 %v809_v45, 0.0  ;;  %v560_v63 = vpop.f32.mrf.mxu0  ;;  %v828_v20 = vadd.f32 %v2114_v16, %v2646_v2  ;;  %v1063_v39 = vmax.f32 %v817_v32, 0.0 }
 0x100   :  { %v1133_v58 = vmul.f32 %v2654_v12, %v998_v49  ;;  %v561_v23 = vadd.f32 %v2646_v2, %v560_v63  ;;  %v819_v30 = vpop.f32.mrf.mxu1 }
 0x101   :  { %1266 = vadd.xlane.f32.xlu0 %v1124_v57  ;;  %v1062_v57 = vmax.f32 %v812_v50, 0.0  ;;  %v1196_v5 = vmul.f32 %v2654_v12, %v1061_v54  ;;  %v1198_v49 = vmul.f32 %v2654_v12, %v1063_v39 }
 0x102   :  { %1268 = vadd.xlane.f32.xlu1 %v1125_v56  ;;  %v548_v56 = vadd.f32 %v2646_v2, %v547_v52  ;;  %v999_v31 = vmax.f32 %v561_v23, 0.0  ;;  %v2117_v34 = vpop.f32.mrf.mxu1 }
 0x103   :  { %v1197_v4 = vmul.f32 %v2654_v12, %v1062_v57 }
 0x104   :  { %v832_v41 = vpop.f32.mrf.mxu1  ;;  %v1134_v42 = vmul.f32 %v2654_v12, %v999_v31 }
 0x105   :  { %1394 = vadd.xlane.f32.xlu0 %v1188_v3  ;;  %v804_v3 = vadd.f32 %v2646_v2, %v803_v60 }
 0x106   :  { %1396 = vadd.xlane.f32.xlu1 %v1189_v1  ;;  %v996_v1 = vmax.f32 %v548_v56, 0.0  ;;  %v2118_v48 = vpop.f32.mrf.mxu1 }
 0x107   :  { %v1060_v10 = vmax.f32 %v804_v3, 0.0  ;;  %v844_v52 = vadd.f32 %v2118_v48, %v2646_v2 }
 0x108   :  { %v1131_v14 = vmul.f32 %v2654_v12, %v996_v1  ;;  %v835_v62 = vpop.f32.mrf.mxu1 }
 0x109   :  { %1262 = vadd.xlane.f32.xlu0 %v1122_v7  ;;  %v2050_v7 = vpop.f32.mrf.mxu0  ;;  %v1195_v21 = vmul.f32 %v2654_v12, %v1060_v10 }
 0x10a   :  { %1264 = vadd.xlane.f32.xlu1 %v1123_v11  ;;  %v569_v11 = vadd.f32 %v2049_v55, %v2646_v2  ;;  %v572_v13 = vadd.f32 %v2050_v7, %v2646_v2  ;;  %v2121_v3 = vpop.f32.mrf.mxu1 }
 0x10b   :  { %v563_v22 = vpop.f32.mrf.mxu0 }
 0x10c   :  { %v1001_v18 = vmax.f32 %v569_v11, 0.0  ;;  %v848_v10 = vpop.f32.mrf.mxu1 }
 0x10d   :  { %1390 = vadd.xlane.f32.xlu0 %v1186_v15  ;;  %v825_v15 = vadd.f32 %v2113_v0, %v2646_v2  ;;  %v2053_v25 = vpop.f32.mrf.mxu0  ;;  %v833_v0 = vadd.f32 %v2646_v2, %v832_v41 }
 0x10e   :  { %1392 = vadd.xlane.f32.xlu1 %v1187_v19  ;;  %v1002_v19 = vmax.f32 %v572_v13, 0.0  ;;  %v1136_v29 = vmul.f32 %v2654_v12, %v1001_v18  ;;  %v2122_v18 = vpop.f32.mrf.mxu1 }
 0x10f   :  { %v1065_v24 = vmax.f32 %v825_v15, 0.0  ;;  %v576_v33 = vpop.f32.mrf.mxu0  ;;  %v1067_v8 = vmax.f32 %v833_v0, 0.0 }
 0x110   :  { %v1137_v28 = vmul.f32 %v2654_v12, %v1002_v19  ;;  %v577_v55 = vadd.f32 %v2646_v2, %v576_v33 }
 0x111   :  { %1274 = vadd.xlane.f32.xlu0 %v1128_v27  ;;  %v1066_v27 = vmax.f32 %v828_v20, 0.0  ;;  %v1200_v38 = vmul.f32 %v2654_v12, %v1065_v24  ;;  %v1202_v19 = vmul.f32 %v2654_v12, %v1067_v8 }
 0x112   :  { %1276 = vadd.xlane.f32.xlu1 %v1129_v26  ;;  %v564_v26 = vadd.f32 %v2646_v2, %v563_v22  ;;  %v1003_v63 = vmax.f32 %v577_v55, 0.0  ;;  %v860_v22 = vadd.f32 %v2122_v18, %v2646_v2 }
 0x113   :  { %v1201_v37 = vmul.f32 %v2654_v12, %v1066_v27 }
 0x114   :  { %v1138_v11 = vmul.f32 %v2654_v12, %v1003_v63 }
 0x115   :  { %1402 = vadd.xlane.f32.xlu0 %v1192_v36  ;;  %v820_v36 = vadd.f32 %v2646_v2, %v819_v30  ;;  %v851_v30 = vpop.f32.mrf.mxu1 }
 0x116   :  { %1404 = vadd.xlane.f32.xlu1 %v1193_v35  ;;  %v1000_v35 = vmax.f32 %v564_v26, 0.0 }
 0x117   :  { %v1064_v43 = vmax.f32 %v820_v36, 0.0  ;;  %v2125_v33 = vpop.f32.mrf.mxu1 }
 0x118   :  { %v1135_v46 = vmul.f32 %v2654_v12, %v1000_v35  ;;  %v852_v35 = vadd.f32 %v2646_v2, %v851_v30 }
 0x119   :  { %1270 = vadd.xlane.f32.xlu0 %v1126_v40  ;;  %v2054_v40 = vpop.f32.mrf.mxu0  ;;  %v1199_v53 = vmul.f32 %v2654_v12, %v1064_v43  ;;  %v864_v41 = vpop.f32.mrf.mxu1 }
 0x11a   :  { %1272 = vadd.xlane.f32.xlu1 %v1127_v44  ;;  %v585_v44 = vadd.f32 %v2053_v25, %v2646_v2  ;;  %v588_v45 = vadd.f32 %v2054_v40, %v2646_v2  ;;  %v1072_v43 = vmax.f32 %v852_v35, 0.0 }
 0x11b   :  { %v579_v54 = vpop.f32.mrf.mxu0 }
 0x11c   :  { %v1005_v50 = vmax.f32 %v585_v44, 0.0  ;;  %v1207_v55 = vmul.f32 %v2654_v12, %v1072_v43 }
 0x11d   :  { %1398 = vadd.xlane.f32.xlu0 %v1190_v47  ;;  %v841_v47 = vadd.f32 %v2117_v34, %v2646_v2  ;;  %v2057_v57 = vpop.f32.mrf.mxu0  ;;  %v849_v34 = vadd.f32 %v2646_v2, %v848_v10 }
 0x11e   :  { %1400 = vadd.xlane.f32.xlu1 %v1191_v51  ;;  %v1006_v51 = vmax.f32 %v588_v45, 0.0  ;;  %v1140_v61 = vmul.f32 %v2654_v12, %v1005_v50  ;;  %v2126_v50 = vpop.f32.mrf.mxu1 }
 0x11f   :  { %v1069_v56 = vmax.f32 %v841_v47, 0.0  ;;  %v592_v1 = vpop.f32.mrf.mxu0 }
 0x120   :  { %v1141_v60 = vmul.f32 %v2654_v12, %v1006_v51  ;;  %v593_v25 = vadd.f32 %v2646_v2, %v592_v1 }
 0x121   :  { %1282 = vadd.xlane.f32.xlu0 %v1132_v59  ;;  %v1070_v59 = vmax.f32 %v844_v52, 0.0  ;;  %v1204_v7 = vmul.f32 %v2654_v12, %v1069_v56  ;;  %v873_v52 = vadd.f32 %v2125_v33, %v2646_v2 }
 0x122   :  { %1284 = vadd.xlane.f32.xlu1 %v1133_v58  ;;  %v580_v58 = vadd.f32 %v2646_v2, %v579_v54 }
 0x123   :  { %v1205_v6 = vmul.f32 %v2654_v12, %v1070_v59  ;;  %v876_v59 = vadd.f32 %v2126_v50, %v2646_v2 }
 0x125   :  { %1410 = vadd.xlane.f32.xlu0 %v1196_v5  ;;  %v836_v5 = vadd.f32 %v2646_v2, %v835_v62  ;;  %v1078_v8 = vmax.f32 %v876_v59, 0.0 }
 0x126   :  { %1412 = vadd.xlane.f32.xlu1 %v1197_v4  ;;  %v1004_v4 = vmax.f32 %v580_v58, 0.0 }
 0x127   :  { %v1068_v13 = vmax.f32 %v836_v5, 0.0 }
 0x128   :  { %v1139_v16 = vmul.f32 %v2654_v12, %v1004_v4 }
 0x129   :  { %1278 = vadd.xlane.f32.xlu0 %v1130_v9  ;;  %v2058_v9 = vpop.f32.mrf.mxu0  ;;  %v1203_v23 = vmul.f32 %v2654_v12, %v1068_v13 }
 0x12a   :  { %1280 = vadd.xlane.f32.xlu1 %v1131_v14  ;;  %v601_v14 = vadd.f32 %v2057_v57, %v2646_v2  ;;  %v604_v15 = vadd.f32 %v2058_v9, %v2646_v2  ;;  %v867_v9 = vpop.f32.mrf.mxu1 }
 0x12b   :  { %v595_v24 = vpop.f32.mrf.mxu0 }
 0x12c   :  { %v1009_v20 = vmax.f32 %v601_v14, 0.0 }
 0x12d   :  { %1406 = vadd.xlane.f32.xlu0 %v1194_v17  ;;  %v857_v17 = vadd.f32 %v2121_v3, %v2646_v2  ;;  %v2061_v27 = vpop.f32.mrf.mxu0  ;;  %v1077_v3 = vmax.f32 %v873_v52, 0.0 }
 0x12e   :  { %1408 = vadd.xlane.f32.xlu1 %v1195_v21  ;;  %v1010_v21 = vmax.f32 %v604_v15, 0.0  ;;  %v1144_v32 = vmul.f32 %v2654_v12, %v1009_v20  ;;  %v617_v44 = vadd.f32 %v2061_v27, %v2646_v2  ;;  %v868_v20 = vadd.f32 %v2646_v2, %v867_v9 }
 0x12f   :  { %v1073_v26 = vmax.f32 %v857_v17, 0.0  ;;  %v608_v36 = vpop.f32.mrf.mxu0  ;;  %v2129_v17 = vpop.f32.mrf.mxu1  ;;  %v1213_v27 = vmul.f32 %v2654_v12, %v1078_v8 }
 0x130   :  { %v1145_v31 = vmul.f32 %v2654_v12, %v1010_v21  ;;  %v1013_v51 = vmax.f32 %v617_v44, 0.0  ;;  %v609_v1 = vadd.f32 %v2646_v2, %v608_v36  ;;  %v1076_v33 = vmax.f32 %v868_v20, 0.0 }
 0x131   :  { %1290 = vadd.xlane.f32.xlu0 %v1136_v29  ;;  %v1074_v29 = vmax.f32 %v860_v22, 0.0  ;;  %v1208_v40 = vmul.f32 %v2654_v12, %v1073_v26  ;;  %v2062_v45 = vpop.f32.mrf.mxu0 }
 0x132   :  { %1292 = vadd.xlane.f32.xlu1 %v1137_v28  ;;  %v596_v28 = vadd.f32 %v2646_v2, %v595_v24  ;;  %v1011_v18 = vmax.f32 %v609_v1, 0.0  ;;  %v1211_v50 = vmul.f32 %v2654_v12, %v1076_v33 }
 0x133   :  { %v1209_v39 = vmul.f32 %v2654_v12, %v1074_v29  ;;  %v611_v58 = vpop.f32.mrf.mxu0 }
 0x134   :  { %v612_v4 = vadd.f32 %v2646_v2, %v611_v58 }
 0x135   :  { %1418 = vadd.xlane.f32.xlu0 %v1200_v38  ;;  %v1008_v38 = vmax.f32 %v596_v28, 0.0  ;;  %v2065_v0 = vpop.f32.mrf.mxu0 }
 0x136   :  { %1420 = vadd.xlane.f32.xlu1 %v1201_v37  ;;  %v1007_v37 = vmax.f32 %v593_v25, 0.0  ;;  %v1012_v24 = vmax.f32 %v612_v4, 0.0 }
 0x137   :  { %v1143_v47 = vmul.f32 %v2654_v12, %v1008_v38 }
 0x138   :  { %v1142_v48 = vmul.f32 %v2654_v12, %v1007_v37  ;;  %v1146_v37 = vmul.f32 %v2654_v12, %v1011_v18 }
 0x139   :  { %1286 = vadd.xlane.f32.xlu0 %v1134_v42  ;;  %v1071_v42 = vmax.f32 %v849_v34, 0.0  ;;  %v633_v34 = vadd.f32 %v2065_v0, %v2646_v2 }
 0x13a   :  { %1288 = vadd.xlane.f32.xlu1 %v1135_v46  ;;  %v620_v46 = vadd.f32 %v2062_v45, %v2646_v2 }
 0x13b   :  { %v1206_v56 = vmul.f32 %v2654_v12, %v1071_v42  ;;  %v1017_v45 = vmax.f32 %v633_v34, 0.0 }
 0x13c   :  { %v1014_v57 = vmax.f32 %v620_v46, 0.0  ;;  %v889_v46 = vadd.f32 %v2129_v17, %v2646_v2 }
 0x13d   :  { %1414 = vadd.xlane.f32.xlu0 %v1198_v49  ;;  %v2800_v49 = vstv %s3571_s4  ;;  %v1152_v1 = vmul.f32 %v2654_v12, %v1017_v45 }
 0x13e   :  { %1416 = vadd.xlane.f32.xlu1 %v1199_v53  ;;  %v1149_v13 = vmul.f32 %v2654_v12, %v1014_v57 }
 0x141   :  { %1298 = vadd.xlane.f32.xlu0 %v1140_v61 }
 0x142   :  { %1300 = vadd.xlane.f32.xlu1 %v1141_v60 }
 0x145   :  { %1426 = vadd.xlane.f32.xlu0 %v1204_v7  ;;  %v1148_v7 = vmul.f32 %v2654_v12, %v1013_v51 }
 0x146   :  { %1428 = vadd.xlane.f32.xlu1 %v1205_v6 }
 0x149   :  { %1294 = vadd.xlane.f32.xlu0 %v1138_v11 }
 0x14a   :  { %1296 = vadd.xlane.f32.xlu1 %v1139_v16  ;;  %v624_v16 = vpop.f32.mrf.mxu0 }
 0x14c   :  { %v2066_v30 = vpop.f32.mrf.mxu0 }
 0x14d   :  { %1422 = vadd.xlane.f32.xlu0 %v1202_v19  ;;  %v865_v19 = vadd.f32 %v2646_v2, %v864_v41  ;;  %v636_v38 = vadd.f32 %v2066_v30, %v2646_v2  ;;  %v1147_v41 = vmul.f32 %v2654_v12, %v1012_v24 }
 0x14e   :  { %1424 = vadd.xlane.f32.xlu1 %v1203_v23  ;;  %v1212_v23 = vmul.f32 %v2654_v12, %v1077_v3 }
 0x14f   :  { %v1018_v52 = vmax.f32 %v636_v38, 0.0 }
 0x151   :  { %1306 = vadd.xlane.f32.xlu0 %v1144_v32  ;;  %v1075_v32 = vmax.f32 %v865_v19, 0.0 }
 0x152   :  { %1308 = vadd.xlane.f32.xlu1 %v1145_v31  ;;  %v880_v31 = vpop.f32.mrf.mxu1 }
 0x153   :  { %v1210_v51 = vmul.f32 %v2654_v12, %v1075_v32 }
 0x154   :  { %v2130_v44 = vpop.f32.mrf.mxu1 }
 0x155   :  { %1434 = vadd.xlane.f32.xlu0 %v1208_v40 }
 0x156   :  { %1436 = vadd.xlane.f32.xlu1 %v1209_v39  ;;  %v883_v4 = vpop.f32.mrf.mxu1 }
 0x159   :  { %1302 = vadd.xlane.f32.xlu0 %v1142_v48 }
 0x15a   :  { %1304 = vadd.xlane.f32.xlu1 %v1143_v47  ;;  %v1371_v53 = vpop.xlane.xlu0 %1370 }
 0x15b   :  { %v1243_v54 = vpop.xlane.xlu1 %1242  ;;  %v1562_v60 = vadd.f32 %v2800_v49, %v1371_v53  ;;  %v627_v53 = vpop.f32.mrf.mxu0 }
 0x15c   :  { %v1498_v61 = vadd.f32 %v2800_v49, %v1243_v54  ;;  %v892_v54 = vadd.f32 %v2130_v44, %v2646_v2 }
 0x15d   :  { %v1690_v62 = vmax.f32 %v1562_v60, 0.0  ;;  %1430 = vadd.xlane.f32.xlu0 %v1206_v56  ;;  %v2069_v59 = vpop.f32.mrf.mxu0  ;;  %v625_v60 = vadd.f32 %v2646_v2, %v624_v16 }
 0x15e   :  { %v1626_v63 = vmax.f32 %v1498_v61, 0.0  ;;  %1432 = vadd.xlane.f32.xlu1 %v1207_v55  ;;  %v1239_v6 = vpop.xlane.xlu0 %1238  ;;  %v1081_v61 = vmax.f32 %v889_v46, 0.0  ;;  %v1082_v3 = vmax.f32 %v892_v54, 0.0 }
 0x15f   :  { %v1245_v5 = vpop.xlane.xlu1 %1244  ;;  %1819 = vst.msk [vmem:[%s3572_s5 + $0x210] sm:$0xff] %vm1752_vm1, %v1690_v62  ;;  %v1496_v11 = vadd.f32 %v2800_v49, %v1239_v6  ;;  %v628_v62 = vadd.f32 %v2646_v2, %v627_v53 }
 0x160   :  { %1755 = vst.msk [vmem:[%s3572_s5 + $0x10] sm:$0xff] %vm1752_vm1, %v1626_v63  ;;  %v1499_v10 = vadd.f32 %v2800_v49, %v1245_v5  ;;  %v1216_v18 = vmul.f32 %v2654_v12, %v1081_v61 }
 0x161   :  { %v1624_v15 = vmax.f32 %v1496_v11, 0.0  ;;  %1314 = vadd.xlane.f32.xlu0 %v1148_v7  ;;  %v1153_v7 = vmul.f32 %v2654_v12, %v1018_v52  ;;  %v2133_v11 = vpop.f32.mrf.mxu1  ;;  %v1016_v19 = vmax.f32 %v628_v62, 0.0 }
 0x162   :  { %v1627_v14 = vmax.f32 %v1499_v10, 0.0  ;;  %1316 = vadd.xlane.f32.xlu1 %v1149_v13  ;;  %v1367_v22 = vpop.xlane.xlu0 %1366  ;;  %v640_v10 = vpop.f32.mrf.mxu0  ;;  %v1015_v13 = vmax.f32 %v625_v60, 0.0 }
 0x163   :  { %v1373_v21 = vpop.xlane.xlu1 %1372  ;;  %1753 = vst.msk [vmem:[%s3572_s5] sm:$0xff] %vm1752_vm1, %v1624_v15  ;;  %v1560_v26 = vadd.f32 %v2800_v49, %v1367_v22  ;;  %v884_v15 = vadd.f32 %v2646_v2, %v883_v4  ;;  %v1217_v22 = vmul.f32 %v2654_v12, %v1082_v3 }
 0x164   :  { %1756 = vst.msk [vmem:[%s3572_s5 + $0x18] sm:$0xff] %vm1752_vm1, %v1627_v14  ;;  %v1563_v25 = vadd.f32 %v2800_v49, %v1373_v21  ;;  %v881_v14 = vadd.f32 %v2646_v2, %v880_v31  ;;  %v1150_v32 = vmul.f32 %v2654_v12, %v1015_v13 }
 0x165   :  { %v1688_v29 = vmax.f32 %v1560_v26, 0.0  ;;  %1442 = vadd.xlane.f32.xlu0 %v1212_v23  ;;  %v896_v26 = vpop.f32.mrf.mxu1 }
 0x166   :  { %v1691_v28 = vmax.f32 %v1563_v25, 0.0  ;;  %1444 = vadd.xlane.f32.xlu1 %v1213_v27  ;;  %v1241_v36 = vpop.xlane.xlu0 %1240  ;;  %v2070_v25 = vpop.f32.mrf.mxu0  ;;  %v1079_v27 = vmax.f32 %v881_v14, 0.0 }
 0x167   :  { %v1369_v35 = vpop.xlane.xlu1 %1368  ;;  %1817 = vst.msk [vmem:[%s3572_s5 + $0x200] sm:$0xff] %vm1752_vm1, %v1688_v29  ;;  %v1497_v40 = vadd.f32 %v2800_v49, %v1241_v36  ;;  %v649_v29 = vadd.f32 %v2069_v59, %v2646_v2  ;;  %v652_v33 = vadd.f32 %v2070_v25, %v2646_v2  ;;  %v1151_v36 = vmul.f32 %v2654_v12, %v1016_v19  ;;  %v2930_v59 = vld [vmem:[%s3570_s3] ss:$0 sm:$0xff] }
 0x168   :  { %1820 = vst.msk [vmem:[%s3572_s5 + $0x218] sm:$0xff] %vm1752_vm1, %v1691_v28  ;;  %v1561_v39 = vadd.f32 %v2800_v49, %v1369_v35  ;;  %v1080_v28 = vmax.f32 %v884_v15, 0.0  ;;  %v1214_v45 = vmul.f32 %v2654_v12, %v1079_v27 }
 0x169   :  { %v1625_v43 = vmax.f32 %v1497_v40, 0.0  ;;  %1310 = vadd.xlane.f32.xlu0 %v1146_v37  ;;  %v1021_v40 = vmax.f32 %v649_v29, 0.0  ;;  %v1022_v46 = vmax.f32 %v652_v33, 0.0 }
 0x16a   :  { %v1689_v42 = vmax.f32 %v1561_v39, 0.0  ;;  %1312 = vadd.xlane.f32.xlu1 %v1147_v41  ;;  %v1251_v48 = vpop.xlane.xlu0 %1250  ;;  %v2134_v39 = vpop.f32.mrf.mxu1  ;;  %v2909_v41 = vld [vmem:[%s3569_s2] ss:$0 sm:$0xff]  ;;  %v1215_v44 = vmul.f32 %v2654_v12, %v1080_v28 }
 0x16b   :  { %v1253_v47 = vpop.xlane.xlu1 %1252  ;;  %1754 = vst.msk [vmem:[%s3572_s5 + $0x8] sm:$0xff] %vm1752_vm1, %v1625_v43  ;;  %v1502_v56 = vadd.f32 %v2800_v49, %v1251_v48  ;;  %v908_v48 = vadd.f32 %v2909_v41, %v2134_v39  ;;  %v641_v54 = vadd.f32 %v2909_v41, %v640_v10  ;;  %v1156_v60 = vmul.f32 %v2930_v59, %v1021_v40 }
 0x16c   :  { %1818 = vst.msk [vmem:[%s3572_s5 + $0x208] sm:$0xff] %vm1752_vm1, %v1689_v42  ;;  %v1503_v55 = vadd.f32 %v2800_v49, %v1253_v47  ;;  %v905_v42 = vadd.f32 %v2909_v41, %v2133_v11  ;;  %v643_v47 = vpop.f32.mrf.mxu0  ;;  %v899_v62 = vpop.f32.mrf.mxu1 }
 0x16d   :  { %v1630_v58 = vmax.f32 %v1502_v56, 0.0  ;;  %1438 = vadd.xlane.f32.xlu0 %v1210_v51  ;;  %v644_v56 = vadd.f32 %v2909_v41, %v643_v47  ;;  %v1086_v61 = vmax.f32 %v908_v48, 0.0 }
 0x16e   :  { %v1631_v57 = vmax.f32 %v1503_v55, 0.0  ;;  %1440 = vadd.xlane.f32.xlu1 %v1211_v50  ;;  %v1379_v0 = vpop.xlane.xlu0 %1378  ;;  %v2073_v53 = vpop.f32.mrf.mxu0  ;;  %v1085_v55 = vmax.f32 %v905_v42, 0.0 }
 0x16f   :  { %v1381_v63 = vpop.xlane.xlu1 %1380  ;;  %1759 = vst.msk [vmem:[%s3572_s5 + $0x30] sm:$0xff] %vm1752_vm1, %v1630_v58  ;;  %v1566_v6 = vadd.f32 %v2800_v49, %v1379_v0  ;;  %v1020_v14 = vmax.f32 %v644_v56, 0.0 }
 0x170   :  { %1760 = vst.msk [vmem:[%s3572_s5 + $0x38] sm:$0xff] %vm1752_vm1, %v1631_v57  ;;  %v1567_v5 = vadd.f32 %v2800_v49, %v1381_v63  ;;  %v1220_v13 = vmul.f32 %v2930_v59, %v1085_v55 }
 0x171   :  { %v1694_v9 = vmax.f32 %v1566_v6, 0.0  ;;  %1322 = vadd.xlane.f32.xlu0 %v1152_v1  ;;  %v1157_v1 = vmul.f32 %v2930_v59, %v1022_v46  ;;  %v2137_v6 = vpop.f32.mrf.mxu1 }
 0x172   :  { %v1695_v8 = vmax.f32 %v1567_v5, 0.0  ;;  %1324 = vadd.xlane.f32.xlu1 %v1153_v7  ;;  %v1247_v17 = vpop.xlane.xlu0 %1246  ;;  %v656_v5 = vpop.f32.mrf.mxu0  ;;  %v1019_v7 = vmax.f32 %v641_v54, 0.0 }
 0x173   :  { %v1249_v16 = vpop.xlane.xlu1 %1248  ;;  %1823 = vst.msk [vmem:[%s3572_s5 + $0x230] sm:$0xff] %vm1752_vm1, %v1694_v9  ;;  %v1500_v21 = vadd.f32 %v2800_v49, %v1247_v17  ;;  %v900_v9 = vadd.f32 %v2909_v41, %v899_v62  ;;  %v1221_v17 = vmul.f32 %v2930_v59, %v1086_v61 }
 0x174   :  { %1824 = vst.msk [vmem:[%s3572_s5 + $0x238] sm:$0xff] %vm1752_vm1, %v1695_v8  ;;  %v1501_v20 = vadd.f32 %v2800_v49, %v1249_v16  ;;  %v897_v8 = vadd.f32 %v2909_v41, %v896_v26  ;;  %v1154_v27 = vmul.f32 %v2930_v59, %v1019_v7 }
 0x175   :  { %v1628_v24 = vmax.f32 %v1500_v21, 0.0  ;;  %1450 = vadd.xlane.f32.xlu0 %v1216_v18  ;;  %v912_v21 = vpop.f32.mrf.mxu1 }
 0x176   :  { %v1629_v23 = vmax.f32 %v1501_v20, 0.0  ;;  %1452 = vadd.xlane.f32.xlu1 %v1217_v22  ;;  %v1375_v31 = vpop.xlane.xlu0 %1374  ;;  %v2074_v20 = vpop.f32.mrf.mxu0  ;;  %v1083_v22 = vmax.f32 %v897_v8, 0.0 }
 0x177   :  { %v1377_v30 = vpop.xlane.xlu1 %1376  ;;  %1757 = vst.msk [vmem:[%s3572_s5 + $0x20] sm:$0xff] %vm1752_vm1, %v1628_v24  ;;  %v1564_v35 = vadd.f32 %v2800_v49, %v1375_v31  ;;  %v665_v24 = vadd.f32 %v2909_v41, %v2073_v53  ;;  %v668_v28 = vadd.f32 %v2909_v41, %v2074_v20  ;;  %v1155_v31 = vmul.f32 %v2930_v59, %v1020_v14 }
 0x178   :  { %1758 = vst.msk [vmem:[%s3572_s5 + $0x28] sm:$0xff] %vm1752_vm1, %v1629_v23  ;;  %v1565_v34 = vadd.f32 %v2800_v49, %v1377_v30  ;;  %v1084_v23 = vmax.f32 %v900_v9, 0.0  ;;  %v1218_v40 = vmul.f32 %v2930_v59, %v1083_v22 }
 0x179   :  { %v1692_v38 = vmax.f32 %v1564_v35, 0.0  ;;  %1318 = vadd.xlane.f32.xlu0 %v1150_v32  ;;  %v1025_v35 = vmax.f32 %v665_v24, 0.0  ;;  %v1026_v42 = vmax.f32 %v668_v28, 0.0 }
 0x17a   :  { %v1693_v37 = vmax.f32 %v1565_v34, 0.0  ;;  %1320 = vadd.xlane.f32.xlu1 %v1151_v36  ;;  %v1259_v43 = vpop.xlane.xlu0 %1258  ;;  %v2138_v34 = vpop.f32.mrf.mxu1  ;;  %v921_v36 = vadd.f32 %v2909_v41, %v2137_v6  ;;  %v1219_v39 = vmul.f32 %v2930_v59, %v1084_v23 }
 0x17b   :  { %v1261_v2 = vpop.xlane.xlu1 %1260  ;;  %1821 = vst.msk [vmem:[%s3572_s5 + $0x220] sm:$0xff] %vm1752_vm1, %v1692_v38  ;;  %v1506_v51 = vadd.f32 %v2800_v49, %v1259_v43  ;;  %v924_v43 = vadd.f32 %v2909_v41, %v2138_v34  ;;  %v1160_v54 = vmul.f32 %v2930_v59, %v1025_v35 }
 0x17c   :  { %1822 = vst.msk [vmem:[%s3572_s5 + $0x228] sm:$0xff] %vm1752_vm1, %v1693_v37  ;;  %v1507_v50 = vadd.f32 %v2800_v49, %v1261_v2  ;;  %v659_v2 = vpop.f32.mrf.mxu0  ;;  %v915_v56 = vpop.f32.mrf.mxu1 }
 0x17d   :  { %v1634_v12 = vmax.f32 %v1506_v51, 0.0  ;;  %1446 = vadd.xlane.f32.xlu0 %v1214_v45  ;;  %v1089_v51 = vmax.f32 %v921_v36, 0.0  ;;  %v1090_v55 = vmax.f32 %v924_v43, 0.0 }
 0x17e   :  { %v1635_v52 = vmax.f32 %v1507_v50, 0.0  ;;  %1448 = vadd.xlane.f32.xlu1 %v1215_v44  ;;  %v1387_v58 = vpop.xlane.xlu0 %1386  ;;  %v2077_v48 = vpop.f32.mrf.mxu0  ;;  %v657_v50 = vadd.f32 %v2909_v41, %v656_v5  ;;  %v916_v5 = vadd.f32 %v2909_v41, %v915_v56 }
 0x17f   :  { %v1389_v57 = vpop.xlane.xlu1 %1388  ;;  %1763 = vst.msk [vmem:[%s3572_s5 + $0x50] sm:$0xff] %vm1752_vm1, %v1634_v12  ;;  %v1570_v0 = vadd.f32 %v2800_v49, %v1387_v58  ;;  %v1225_v9 = vmul.f32 %v2930_v59, %v1090_v55  ;;  %v681_v20 = vadd.f32 %v2909_v41, %v2077_v48 }
 0x180   :  { %1764 = vst.msk [vmem:[%s3572_s5 + $0x58] sm:$0xff] %vm1752_vm1, %v1635_v52  ;;  %v1571_v63 = vadd.f32 %v2800_v49, %v1389_v57  ;;  %v660_v52 = vadd.f32 %v2909_v41, %v659_v2 }
 0x181   :  { %v1698_v4 = vmax.f32 %v1570_v0, 0.0  ;;  %1330 = vadd.xlane.f32.xlu0 %v1156_v60  ;;  %v1161_v60 = vmul.f32 %v2930_v59, %v1026_v42  ;;  %v2141_v0 = vpop.f32.mrf.mxu1 }
 0x182   :  { %v1699_v3 = vmax.f32 %v1571_v63, 0.0  ;;  %1332 = vadd.xlane.f32.xlu1 %v1157_v1  ;;  %v1255_v11 = vpop.xlane.xlu0 %1254  ;;  %v672_v63 = vpop.f32.mrf.mxu0  ;;  %v1023_v1 = vmax.f32 %v657_v50, 0.0  ;;  %v1024_v8 = vmax.f32 %v660_v52, 0.0 }
 0x183   :  { %v1257_v10 = vpop.xlane.xlu1 %1256  ;;  %1827 = vst.msk [vmem:[%s3572_s5 + $0x250] sm:$0xff] %vm1752_vm1, %v1698_v4  ;;  %v1504_v16 = vadd.f32 %v2800_v49, %v1255_v11  ;;  %v913_v4 = vadd.f32 %v2909_v41, %v912_v21 }
 0x184   :  { %1828 = vst.msk [vmem:[%s3572_s5 + $0x258] sm:$0xff] %vm1752_vm1, %v1699_v3  ;;  %v1505_v15 = vadd.f32 %v2800_v49, %v1257_v10  ;;  %v1224_v3 = vmul.f32 %v2930_v59, %v1089_v51  ;;  %v1159_v23 = vmul.f32 %v2930_v59, %v1024_v8 }
 0x185   :  { %v1632_v19 = vmax.f32 %v1504_v16, 0.0  ;;  %1458 = vadd.xlane.f32.xlu0 %v1220_v13  ;;  %v928_v16 = vpop.f32.mrf.mxu1 }
 0x186   :  { %v1633_v18 = vmax.f32 %v1505_v15, 0.0  ;;  %1460 = vadd.xlane.f32.xlu1 %v1221_v17  ;;  %v1383_v26 = vpop.xlane.xlu0 %1382  ;;  %v2078_v15 = vpop.f32.mrf.mxu0  ;;  %v1158_v17 = vmul.f32 %v2930_v59, %v1023_v1 }
 0x187   :  { %v1385_v25 = vpop.xlane.xlu1 %1384  ;;  %1761 = vst.msk [vmem:[%s3572_s5 + $0x40] sm:$0xff] %vm1752_vm1, %v1632_v19  ;;  %v1568_v30 = vadd.f32 %v2800_v49, %v1383_v26  ;;  %v1088_v19 = vmax.f32 %v916_v5, 0.0  ;;  %v684_v24 = vadd.f32 %v2909_v41, %v2078_v15 }
 0x188   :  { %1762 = vst.msk [vmem:[%s3572_s5 + $0x48] sm:$0xff] %vm1752_vm1, %v1633_v18  ;;  %v1569_v29 = vadd.f32 %v2800_v49, %v1385_v25  ;;  %v1087_v18 = vmax.f32 %v913_v4, 0.0 }
 0x189   :  { %v1696_v33 = vmax.f32 %v1568_v30, 0.0  ;;  %1326 = vadd.xlane.f32.xlu0 %v1154_v27  ;;  %v1030_v36 = vmax.f32 %v684_v24, 0.0 }
 0x18a   :  { %v1697_v32 = vmax.f32 %v1569_v29, 0.0  ;;  %1328 = vadd.xlane.f32.xlu1 %v1155_v31  ;;  %v1267_v38 = vpop.xlane.xlu0 %1266  ;;  %v2142_v29 = vpop.f32.mrf.mxu1  ;;  %v1222_v30 = vmul.f32 %v2930_v59, %v1087_v18  ;;  %v1223_v31 = vmul.f32 %v2930_v59, %v1088_v19 }
 0x18b   :  { %v1269_v37 = vpop.xlane.xlu1 %1268  ;;  %1825 = vst.msk [vmem:[%s3572_s5 + $0x240] sm:$0xff] %vm1752_vm1, %v1696_v33  ;;  %v1510_v45 = vadd.f32 %v2800_v49, %v1267_v38  ;;  %v937_v33 = vadd.f32 %v2909_v41, %v2141_v0  ;;  %v940_v38 = vadd.f32 %v2909_v41, %v2142_v29  ;;  %v1165_v51 = vmul.f32 %v2930_v59, %v1030_v36 }
 0x18c   :  { %1826 = vst.msk [vmem:[%s3572_s5 + $0x248] sm:$0xff] %vm1752_vm1, %v1697_v32  ;;  %v1511_v44 = vadd.f32 %v2800_v49, %v1269_v37  ;;  %v1029_v32 = vmax.f32 %v681_v20, 0.0  ;;  %v675_v37 = vpop.f32.mrf.mxu0 }
 0x18d   :  { %v1638_v47 = vmax.f32 %v1510_v45, 0.0  ;;  %1454 = vadd.xlane.f32.xlu0 %v1218_v40  ;;  %v673_v45 = vadd.f32 %v2909_v41, %v672_v63  ;;  %v1094_v52 = vmax.f32 %v940_v38, 0.0 }
 0x18e   :  { %v1639_v46 = vmax.f32 %v1511_v44, 0.0  ;;  %1456 = vadd.xlane.f32.xlu1 %v1219_v39  ;;  %v1395_v53 = vpop.xlane.xlu0 %1394  ;;  %v2081_v43 = vpop.f32.mrf.mxu0  ;;  %v1164_v44 = vmul.f32 %v2930_v59, %v1029_v32 }
 0x18f   :  { %v1397_v12 = vpop.xlane.xlu1 %1396  ;;  %1767 = vst.msk [vmem:[%s3572_s5 + $0x70] sm:$0xff] %vm1752_vm1, %v1638_v47  ;;  %v1574_v58 = vadd.f32 %v2800_v49, %v1395_v53  ;;  %v676_v47 = vadd.f32 %v2909_v41, %v675_v37  ;;  %v1229_v4 = vmul.f32 %v2930_v59, %v1094_v52  ;;  %v697_v15 = vadd.f32 %v2909_v41, %v2081_v43 }
 0x190   :  { %1768 = vst.msk [vmem:[%s3572_s5 + $0x78] sm:$0xff] %vm1752_vm1, %v1639_v46  ;;  %v1575_v57 = vadd.f32 %v2800_v49, %v1397_v12  ;;  %v1093_v46 = vmax.f32 %v937_v33, 0.0  ;;  %v931_v12 = vpop.f32.mrf.mxu1 }
 0x191   :  { %v1702_v62 = vmax.f32 %v1574_v58, 0.0  ;;  %1338 = vadd.xlane.f32.xlu0 %v1160_v54  ;;  %v932_v63 = vadd.f32 %v2909_v41, %v931_v12 }
 0x192   :  { %v1703_v61 = vmax.f32 %v1575_v57, 0.0  ;;  %1340 = vadd.xlane.f32.xlu1 %v1161_v60  ;;  %v1263_v7 = vpop.xlane.xlu0 %1262  ;;  %v688_v57 = vpop.f32.mrf.mxu0  ;;  %v1027_v60 = vmax.f32 %v673_v45, 0.0 }
 0x193   :  { %v1265_v6 = vpop.xlane.xlu1 %1264  ;;  %1831 = vst.msk [vmem:[%s3572_s5 + $0x270] sm:$0xff] %vm1752_vm1, %v1702_v62  ;;  %v1508_v11 = vadd.f32 %v2800_v49, %v1263_v7  ;;  %v2145_v58 = vpop.f32.mrf.mxu1  ;;  %v929_v62 = vadd.f32 %v2909_v41, %v928_v16 }
 0x194   :  { %1832 = vst.msk [vmem:[%s3572_s5 + $0x278] sm:$0xff] %vm1752_vm1, %v1703_v61  ;;  %v1509_v10 = vadd.f32 %v2800_v49, %v1265_v6  ;;  %v1228_v61 = vmul.f32 %v2930_v59, %v1093_v46  ;;  %v953_v29 = vadd.f32 %v2909_v41, %v2145_v58 }
 0x195   :  { %v1636_v14 = vmax.f32 %v1508_v11, 0.0  ;;  %1466 = vadd.xlane.f32.xlu0 %v1224_v3  ;;  %v1028_v3 = vmax.f32 %v676_v47, 0.0  ;;  %v1162_v11 = vmul.f32 %v2930_v59, %v1027_v60 }
 0x196   :  { %v1637_v13 = vmax.f32 %v1509_v10, 0.0  ;;  %1468 = vadd.xlane.f32.xlu1 %v1225_v9  ;;  %v1391_v22 = vpop.xlane.xlu0 %1390  ;;  %v2082_v9 = vpop.f32.mrf.mxu0 }
 0x197   :  { %v1393_v21 = vpop.xlane.xlu1 %1392  ;;  %1765 = vst.msk [vmem:[%s3572_s5 + $0x60] sm:$0xff] %vm1752_vm1, %v1636_v14  ;;  %v1572_v26 = vadd.f32 %v2800_v49, %v1391_v22  ;;  %v944_v10 = vpop.f32.mrf.mxu1  ;;  %v1092_v14 = vmax.f32 %v932_v63, 0.0  ;;  %v1163_v18 = vmul.f32 %v2930_v59, %v1028_v3  ;;  %v700_v19 = vadd.f32 %v2909_v41, %v2082_v9 }
 0x198   :  { %1766 = vst.msk [vmem:[%s3572_s5 + $0x68] sm:$0xff] %vm1752_vm1, %v1637_v13  ;;  %v1573_v25 = vadd.f32 %v2800_v49, %v1393_v21  ;;  %v1091_v13 = vmax.f32 %v929_v62, 0.0  ;;  %v691_v22 = vpop.f32.mrf.mxu0 }
 0x199   :  { %v1700_v28 = vmax.f32 %v1572_v26, 0.0  ;;  %1334 = vadd.xlane.f32.xlu0 %v1158_v17  ;;  %v1034_v32 = vmax.f32 %v700_v19, 0.0  ;;  %v692_v43 = vadd.f32 %v2909_v41, %v691_v22 }
 0x19a   :  { %v1701_v27 = vmax.f32 %v1573_v25, 0.0  ;;  %1336 = vadd.xlane.f32.xlu1 %v1159_v23  ;;  %v1275_v35 = vpop.xlane.xlu0 %1274  ;;  %v2146_v25 = vpop.f32.mrf.mxu1  ;;  %v1226_v26 = vmul.f32 %v2930_v59, %v1091_v13 }
 0x19b   :  { %v1277_v34 = vpop.xlane.xlu1 %1276  ;;  %1829 = vst.msk [vmem:[%s3572_s5 + $0x260] sm:$0xff] %vm1752_vm1, %v1700_v28  ;;  %v1514_v40 = vadd.f32 %v2800_v49, %v1275_v35  ;;  %v1033_v28 = vmax.f32 %v697_v15, 0.0  ;;  %v956_v33 = vadd.f32 %v2909_v41, %v2146_v25  ;;  %v2085_v36 = vpop.f32.mrf.mxu0  ;;  %v1169_v46 = vmul.f32 %v2930_v59, %v1034_v32 }
 0x19c   :  { %1830 = vst.msk [vmem:[%s3572_s5 + $0x268] sm:$0xff] %vm1752_vm1, %v1701_v27  ;;  %v1515_v39 = vadd.f32 %v2800_v49, %v1277_v34  ;;  %v1227_v27 = vmul.f32 %v2930_v59, %v1092_v14  ;;  %v947_v37 = vpop.f32.mrf.mxu1  ;;  %v713_v9 = vadd.f32 %v2909_v41, %v2085_v36 }
 0x19d   :  { %v1642_v2 = vmax.f32 %v1514_v40, 0.0  ;;  %1462 = vadd.xlane.f32.xlu0 %v1222_v30  ;;  %v1168_v40 = vmul.f32 %v2930_v59, %v1033_v28  ;;  %v1098_v47 = vmax.f32 %v956_v33, 0.0  ;;  %v704_v52 = vpop.f32.mrf.mxu0 }
 0x19e   :  { %v1643_v42 = vmax.f32 %v1515_v39, 0.0  ;;  %1464 = vadd.xlane.f32.xlu1 %v1223_v31  ;;  %v1403_v50 = vpop.xlane.xlu0 %1402 }
 0x19f   :  { %v1405_v48 = vpop.xlane.xlu1 %1404  ;;  %1771 = vst.msk [vmem:[%s3572_s5 + $0x90] sm:$0xff] %vm1752_vm1, %v1642_v2  ;;  %v1578_v54 = vadd.f32 %v2800_v49, %v1403_v50  ;;  %v1097_v2 = vmax.f32 %v953_v29, 0.0  ;;  %v1233_v62 = vmul.f32 %v2930_v59, %v1098_v47  ;;  %v2086_v3 = vpop.f32.mrf.mxu0 }
 0x1a0   :  { %1772 = vst.msk [vmem:[%s3572_s5 + $0x98] sm:$0xff] %vm1752_vm1, %v1643_v42  ;;  %v1579_v53 = vadd.f32 %v2800_v49, %v1405_v48  ;;  %v689_v42 = vadd.f32 %v2909_v41, %v688_v57  ;;  %v948_v57 = vadd.f32 %v2909_v41, %v947_v37  ;;  %v716_v14 = vadd.f32 %v2909_v41, %v2086_v3 }
 0x1a1   :  { %v1706_v56 = vmax.f32 %v1578_v54, 0.0  ;;  %1346 = vadd.xlane.f32.xlu0 %v1164_v44 }
 0x1a2   :  { %v1707_v55 = vmax.f32 %v1579_v53, 0.0  ;;  %1348 = vadd.xlane.f32.xlu1 %v1165_v51  ;;  %v1271_v1 = vpop.xlane.xlu0 %1270  ;;  %v3112_v51 = vpop.f32.mrf.mxu1  ;;  %v1031_v54 = vmax.f32 %v689_v42, 0.0 }
 0x1a3   :  { %v1273_v0 = vpop.xlane.xlu1 %1272  ;;  %1835 = vst.msk [vmem:[%s3572_s5 + $0x290] sm:$0xff] %vm1752_vm1, %v1706_v56  ;;  %v1512_v6 = vadd.f32 %v2800_v49, %v1271_v1  ;;  %v945_v56 = vadd.f32 %v2909_v41, %v944_v10  ;;  %v969_v47 = vadd.f32 %v2909_v41, %v3112_v51 }
 0x1a4   :  { %1836 = vst.msk [vmem:[%s3572_s5 + $0x298] sm:$0xff] %vm1752_vm1, %v1707_v55  ;;  %v1513_v5 = vadd.f32 %v2800_v49, %v1273_v0  ;;  %v1232_v55 = vmul.f32 %v2930_v59, %v1097_v2  ;;  %v960_v1 = vpop.f32.mrf.mxu1 }
 0x1a5   :  { %v1640_v8 = vmax.f32 %v1512_v6, 0.0  ;;  %1474 = vadd.xlane.f32.xlu0 %v1228_v61  ;;  %v1032_v61 = vmax.f32 %v692_v43, 0.0  ;;  %v1166_v6 = vmul.f32 %v2930_v59, %v1031_v54  ;;  %v961_v36 = vadd.f32 %v2909_v41, %v960_v1 }
 0x1a6   :  { %v1641_v7 = vmax.f32 %v1513_v5, 0.0  ;;  %1476 = vadd.xlane.f32.xlu1 %v1229_v4  ;;  %v1399_v17 = vpop.xlane.xlu0 %1398 }
 0x1a7   :  { %v1401_v16 = vpop.xlane.xlu1 %1400  ;;  %1769 = vst.msk [vmem:[%s3572_s5 + $0x80] sm:$0xff] %vm1752_vm1, %v1640_v8  ;;  %v1576_v21 = vadd.f32 %v2800_v49, %v1399_v17  ;;  %v1096_v8 = vmax.f32 %v948_v57, 0.0  ;;  %v1167_v13 = vmul.f32 %v2930_v59, %v1032_v61  ;;  %v2150_v17 = vpop.f32.mrf.mxu1  ;;  %v1101_v57 = vmax.f32 %v969_v47, 0.0 }
 0x1a8   :  { %1770 = vst.msk [vmem:[%s3572_s5 + $0x88] sm:$0xff] %vm1752_vm1, %v1641_v7  ;;  %v1577_v20 = vadd.f32 %v2800_v49, %v1401_v16  ;;  %v1095_v7 = vmax.f32 %v945_v56, 0.0 }
 0x1a9   :  { %v1704_v24 = vmax.f32 %v1576_v21, 0.0  ;;  %1342 = vadd.xlane.f32.xlu0 %v1162_v11  ;;  %v1231_v22 = vmul.f32 %v2930_v59, %v1096_v8 }
 0x1aa   :  { %v1705_v23 = vmax.f32 %v1577_v20, 0.0  ;;  %1344 = vadd.xlane.f32.xlu1 %v1163_v18  ;;  %v1283_v31 = vpop.xlane.xlu0 %1282  ;;  %v707_v18 = vpop.f32.mrf.mxu0  ;;  %v1230_v21 = vmul.f32 %v2930_v59, %v1095_v7  ;;  %v1236_v7 = vmul.f32 %v2930_v59, %v1101_v57 }
 0x1ab   :  { %v1285_v30 = vpop.xlane.xlu1 %1284  ;;  %1833 = vst.msk [vmem:[%s3572_s5 + $0x280] sm:$0xff] %vm1752_vm1, %v1704_v24  ;;  %v1518_v35 = vadd.f32 %v2800_v49, %v1283_v31  ;;  %v705_v24 = vadd.f32 %v2909_v41, %v704_v52  ;;  %v708_v28 = vadd.f32 %v2909_v41, %v707_v18  ;;  %v963_v31 = vpop.f32.mrf.mxu1 }
 0x1ac   :  { %1834 = vst.msk [vmem:[%s3572_s5 + $0x288] sm:$0xff] %vm1752_vm1, %v1705_v23  ;;  %v1519_v34 = vadd.f32 %v2800_v49, %v1285_v30  ;;  %v1037_v23 = vmax.f32 %v713_v9, 0.0  ;;  %v964_v37 = vadd.f32 %v2909_v41, %v963_v31 }
 0x1ad   :  { %v1646_v39 = vmax.f32 %v1518_v35, 0.0  ;;  %1470 = vadd.xlane.f32.xlu0 %v1226_v26  ;;  %v1035_v35 = vmax.f32 %v705_v24, 0.0  ;;  %v1036_v42 = vmax.f32 %v708_v28, 0.0 }
 0x1ae   :  { %v1647_v38 = vmax.f32 %v1519_v34, 0.0  ;;  %1472 = vadd.xlane.f32.xlu1 %v1227_v27  ;;  %v1411_v45 = vpop.xlane.xlu0 %1410  ;;  %v1038_v27 = vmax.f32 %v716_v14, 0.0  ;;  %v1172_v34 = vmul.f32 %v2930_v59, %v1037_v23  ;;  %v1100_v54 = vmax.f32 %v964_v37, 0.0 }
 0x1af   :  { %v1413_v44 = vpop.xlane.xlu1 %1412  ;;  %1775 = vst.msk [vmem:[%s3572_s5 + $0xb0] sm:$0xff] %vm1752_vm1, %v1646_v39  ;;  %v1582_v50 = vadd.f32 %v2800_v49, %v1411_v45 }
 0x1b0   :  { %1776 = vst.msk [vmem:[%s3572_s5 + $0xb8] sm:$0xff] %vm1752_vm1, %v1647_v38  ;;  %v1583_v48 = vadd.f32 %v2800_v49, %v1413_v44 }
 0x1b1   :  { %v1710_v53 = vmax.f32 %v1582_v50, 0.0  ;;  %1354 = vadd.xlane.f32.xlu0 %v1168_v40  ;;  %v1173_v40 = vmul.f32 %v2930_v59, %v1038_v27  ;;  %v972_v50 = vadd.f32 %v2909_v41, %v2150_v17 }
 0x1b2   :  { %v1711_v12 = vmax.f32 %v1583_v48, 0.0  ;;  %1356 = vadd.xlane.f32.xlu1 %v1169_v46  ;;  %v1279_v60 = vpop.xlane.xlu0 %1278  ;;  %v1170_v46 = vmul.f32 %v2930_v59, %v1035_v35  ;;  %v1099_v48 = vmax.f32 %v961_v36, 0.0 }
 0x1b3   :  { %v1281_v58 = vpop.xlane.xlu1 %1280  ;;  %1839 = vst.msk [vmem:[%s3572_s5 + $0x2b0] sm:$0xff] %vm1752_vm1, %v1710_v53  ;;  %v1516_v0 = vadd.f32 %v2800_v49, %v1279_v60  ;;  %v1171_v53 = vmul.f32 %v2930_v59, %v1036_v42 }
 0x1b4   :  { %1840 = vst.msk [vmem:[%s3572_s5 + $0x2b8] sm:$0xff] %vm1752_vm1, %v1711_v12  ;;  %v1517_v63 = vadd.f32 %v2800_v49, %v1281_v58  ;;  %v1234_v58 = vmul.f32 %v2930_v59, %v1099_v48 }
 0x1b5   :  { %v1644_v5 = vmax.f32 %v1516_v0, 0.0  ;;  %1482 = vadd.xlane.f32.xlu0 %v1232_v55 }
 0x1b6   :  { %v1645_v4 = vmax.f32 %v1517_v63, 0.0  ;;  %1484 = vadd.xlane.f32.xlu1 %v1233_v62  ;;  %v1407_v11 = vpop.xlane.xlu0 %1406  ;;  %v1102_v62 = vmax.f32 %v972_v50, 0.0  ;;  %v1235_v63 = vmul.f32 %v2930_v59, %v1100_v54 }
 0x1b7   :  { %v1409_v10 = vpop.xlane.xlu1 %1408  ;;  %1773 = vst.msk [vmem:[%s3572_s5 + $0xa0] sm:$0xff] %vm1752_vm1, %v1644_v5  ;;  %v1580_v16 = vadd.f32 %v2800_v49, %v1407_v11 }
 0x1b8   :  { %1774 = vst.msk [vmem:[%s3572_s5 + $0xa8] sm:$0xff] %vm1752_vm1, %v1645_v4  ;;  %v1581_v15 = vadd.f32 %v2800_v49, %v1409_v10  ;;  %v1237_v8 = vmul.f32 %v2930_v59, %v1102_v62 }
 0x1b9   :  { %v1708_v20 = vmax.f32 %v1580_v16, 0.0  ;;  %1350 = vadd.xlane.f32.xlu0 %v1166_v6 }
 0x1ba   :  { %v1709_v19 = vmax.f32 %v1581_v15, 0.0  ;;  %1352 = vadd.xlane.f32.xlu1 %v1167_v13  ;;  %v1291_v26 = vpop.xlane.xlu0 %1290 }
 0x1bb   :  { %v1293_v25 = vpop.xlane.xlu1 %1292  ;;  %1837 = vst.msk [vmem:[%s3572_s5 + $0x2a0] sm:$0xff] %vm1752_vm1, %v1708_v20  ;;  %v1522_v30 = vadd.f32 %v2800_v49, %v1291_v26 }
 0x1bc   :  { %1838 = vst.msk [vmem:[%s3572_s5 + $0x2a8] sm:$0xff] %vm1752_vm1, %v1709_v19  ;;  %v1523_v29 = vadd.f32 %v2800_v49, %v1293_v25 }
 0x1bd   :  { %v1650_v33 = vmax.f32 %v1522_v30, 0.0  ;;  %1478 = vadd.xlane.f32.xlu0 %v1230_v21 }
 0x1be   :  { %v1651_v32 = vmax.f32 %v1523_v29, 0.0  ;;  %1480 = vadd.xlane.f32.xlu1 %v1231_v22  ;;  %v1419_v39 = vpop.xlane.xlu0 %1418 }
 0x1bf   :  { %v1421_v38 = vpop.xlane.xlu1 %1420  ;;  %1779 = vst.msk [vmem:[%s3572_s5 + $0xd0] sm:$0xff] %vm1752_vm1, %v1650_v33  ;;  %v1586_v43 = vadd.f32 %v2800_v49, %v1419_v39 }
 0x1c0   :  { %1780 = vst.msk [vmem:[%s3572_s5 + $0xd8] sm:$0xff] %vm1752_vm1, %v1651_v32  ;;  %v1587_v2 = vadd.f32 %v2800_v49, %v1421_v38 }
 0x1c1   :  { %v1714_v45 = vmax.f32 %v1586_v43, 0.0  ;;  %1362 = vadd.xlane.f32.xlu0 %v1172_v34 }
 0x1c2   :  { %v1715_v44 = vmax.f32 %v1587_v2, 0.0  ;;  %1364 = vadd.xlane.f32.xlu1 %v1173_v40  ;;  %v1287_v12 = vpop.xlane.xlu0 %1286 }
 0x1c3   :  { %v1289_v52 = vpop.xlane.xlu1 %1288  ;;  %1843 = vst.msk [vmem:[%s3572_s5 + $0x2d0] sm:$0xff] %vm1752_vm1, %v1714_v45  ;;  %v1520_v55 = vadd.f32 %v2800_v49, %v1287_v12 }
 0x1c4   :  { %1844 = vst.msk [vmem:[%s3572_s5 + $0x2d8] sm:$0xff] %vm1752_vm1, %v1715_v44  ;;  %v1521_v51 = vadd.f32 %v2800_v49, %v1289_v52 }
 0x1c5   :  { %v1648_v56 = vmax.f32 %v1520_v55, 0.0  ;;  %1358 = vadd.xlane.f32.xlu0 %v1170_v46 }
 0x1c6   :  { %v1649_v41 = vmax.f32 %v1521_v51, 0.0  ;;  %1360 = vadd.xlane.f32.xlu1 %v1171_v53  ;;  %v1415_v61 = vpop.xlane.xlu0 %1414 }
 0x1c7   :  { %v1417_v60 = vpop.xlane.xlu1 %1416  ;;  %1777 = vst.msk [vmem:[%s3572_s5 + $0xc0] sm:$0xff] %vm1752_vm1, %v1648_v56  ;;  %v1584_v1 = vadd.f32 %v2800_v49, %v1415_v61 }
 0x1c8   :  { %1778 = vst.msk [vmem:[%s3572_s5 + $0xc8] sm:$0xff] %vm1752_vm1, %v1649_v41  ;;  %v1585_v0 = vadd.f32 %v2800_v49, %v1417_v60 }
 0x1c9   :  { %v1712_v4 = vmax.f32 %v1584_v1, 0.0  ;;  %1486 = vadd.xlane.f32.xlu0 %v1234_v58 }
 0x1ca   :  { %v1713_v3 = vmax.f32 %v1585_v0, 0.0  ;;  %1488 = vadd.xlane.f32.xlu1 %v1235_v63  ;;  %v1299_v6 = vpop.xlane.xlu0 %1298 }
 0x1cb   :  { %v1301_v5 = vpop.xlane.xlu1 %1300  ;;  %1841 = vst.msk [vmem:[%s3572_s5 + $0x2c0] sm:$0xff] %vm1752_vm1, %v1712_v4  ;;  %v1526_v10 = vadd.f32 %v2800_v49, %v1299_v6 }
 0x1cc   :  { %1842 = vst.msk [vmem:[%s3572_s5 + $0x2c8] sm:$0xff] %vm1752_vm1, %v1713_v3  ;;  %v1527_v9 = vadd.f32 %v2800_v49, %v1301_v5 }
 0x1cd   :  { %v1654_v13 = vmax.f32 %v1526_v10, 0.0  ;;  %1490 = vadd.xlane.f32.xlu0 %v1236_v7 }
 0x1ce   :  { %v1655_v11 = vmax.f32 %v1527_v9, 0.0  ;;  %1492 = vadd.xlane.f32.xlu1 %v1237_v8  ;;  %v1427_v59 = vpop.xlane.xlu0 %1426 }
 0x1cf   :  { %v1429_v14 = vpop.xlane.xlu1 %1428  ;;  %1783 = vst.msk [vmem:[%s3572_s5 + $0xf0] sm:$0xff] %vm1752_vm1, %v1654_v13  ;;  %v1590_v16 = vadd.f32 %v2800_v49, %v1427_v59 }
 0x1d0   :  { %1784 = vst.msk [vmem:[%s3572_s5 + $0xf8] sm:$0xff] %vm1752_vm1, %v1655_v11  ;;  %v1591_v15 = vadd.f32 %v2800_v49, %v1429_v14 }
 0x1d1   :  { %v1718_v18 = vmax.f32 %v1590_v16, 0.0 }
 0x1d2   :  { %v1719_v17 = vmax.f32 %v1591_v15, 0.0  ;;  %v1295_v20 = vpop.xlane.xlu0 %1294 }
 0x1d3   :  { %v1297_v19 = vpop.xlane.xlu1 %1296  ;;  %1847 = vst.msk [vmem:[%s3572_s5 + $0x2f0] sm:$0xff] %vm1752_vm1, %v1718_v18  ;;  %v1524_v22 = vadd.f32 %v2800_v49, %v1295_v20 }
 0x1d4   :  { %1848 = vst.msk [vmem:[%s3572_s5 + $0x2f8] sm:$0xff] %vm1752_vm1, %v1719_v17  ;;  %v1525_v21 = vadd.f32 %v2800_v49, %v1297_v19 }
 0x1d5   :  { %v1652_v24 = vmax.f32 %v1524_v22, 0.0 }
 0x1d6   :  { %v1653_v23 = vmax.f32 %v1525_v21, 0.0  ;;  %v1423_v26 = vpop.xlane.xlu0 %1422 }
 0x1d7   :  { %v1425_v25 = vpop.xlane.xlu1 %1424  ;;  %1781 = vst.msk [vmem:[%s3572_s5 + $0xe0] sm:$0xff] %vm1752_vm1, %v1652_v24  ;;  %v1588_v28 = vadd.f32 %v2800_v49, %v1423_v26 }
 0x1d8   :  { %1782 = vst.msk [vmem:[%s3572_s5 + $0xe8] sm:$0xff] %vm1752_vm1, %v1653_v23  ;;  %v1589_v27 = vadd.f32 %v2800_v49, %v1425_v25 }
 0x1d9   :  { %v1716_v30 = vmax.f32 %v1588_v28, 0.0 }
 0x1da   :  { %v1717_v29 = vmax.f32 %v1589_v27, 0.0  ;;  %v1307_v32 = vpop.xlane.xlu0 %1306 }
 0x1db   :  { %v1309_v31 = vpop.xlane.xlu1 %1308  ;;  %1845 = vst.msk [vmem:[%s3572_s5 + $0x2e0] sm:$0xff] %vm1752_vm1, %v1716_v30  ;;  %v1530_v34 = vadd.f32 %v2800_v49, %v1307_v32 }
 0x1dc   :  { %1846 = vst.msk [vmem:[%s3572_s5 + $0x2e8] sm:$0xff] %vm1752_vm1, %v1717_v29  ;;  %v1531_v33 = vadd.f32 %v2800_v49, %v1309_v31 }
 0x1dd   :  { %v1658_v36 = vmax.f32 %v1530_v34, 0.0 }
 0x1de   :  { %v1659_v35 = vmax.f32 %v1531_v33, 0.0  ;;  %v1435_v38 = vpop.xlane.xlu0 %1434 }
 0x1df   :  { %v1437_v37 = vpop.xlane.xlu1 %1436  ;;  %1787 = vst.msk [vmem:[%s3572_s5 + $0x110] sm:$0xff] %vm1752_vm1, %v1658_v36  ;;  %v1594_v40 = vadd.f32 %v2800_v49, %v1435_v38 }
 0x1e0   :  { %1788 = vst.msk [vmem:[%s3572_s5 + $0x118] sm:$0xff] %vm1752_vm1, %v1659_v35  ;;  %v1595_v39 = vadd.f32 %v2800_v49, %v1437_v37 }
 0x1e1   :  { %v1722_v2 = vmax.f32 %v1594_v40, 0.0 }
 0x1e2   :  { %v1723_v42 = vmax.f32 %v1595_v39, 0.0  ;;  %v1303_v44 = vpop.xlane.xlu0 %1302 }
 0x1e3   :  { %v1305_v43 = vpop.xlane.xlu1 %1304  ;;  %1851 = vst.msk [vmem:[%s3572_s5 + $0x310] sm:$0xff] %vm1752_vm1, %v1722_v2  ;;  %v1528_v46 = vadd.f32 %v2800_v49, %v1303_v44 }
 0x1e4   :  { %1852 = vst.msk [vmem:[%s3572_s5 + $0x318] sm:$0xff] %vm1752_vm1, %v1723_v42  ;;  %v1529_v45 = vadd.f32 %v2800_v49, %v1305_v43 }
 0x1e5   :  { %v1656_v48 = vmax.f32 %v1528_v46, 0.0 }
 0x1e6   :  { %v1657_v47 = vmax.f32 %v1529_v45, 0.0  ;;  %v1431_v52 = vpop.xlane.xlu0 %1430 }
 0x1e7   :  { %v1433_v50 = vpop.xlane.xlu1 %1432  ;;  %1785 = vst.msk [vmem:[%s3572_s5 + $0x100] sm:$0xff] %vm1752_vm1, %v1656_v48  ;;  %v1592_v53 = vadd.f32 %v2800_v49, %v1431_v52 }
 0x1e8   :  { %1786 = vst.msk [vmem:[%s3572_s5 + $0x108] sm:$0xff] %vm1752_vm1, %v1657_v47  ;;  %v1593_v12 = vadd.f32 %v2800_v49, %v1433_v50 }
 0x1e9   :  { %v1720_v51 = vmax.f32 %v1592_v53, 0.0 }
 0x1ea   :  { %v1721_v54 = vmax.f32 %v1593_v12, 0.0  ;;  %v1315_v41 = vpop.xlane.xlu0 %1314 }
 0x1eb   :  { %v1317_v55 = vpop.xlane.xlu1 %1316  ;;  %1849 = vst.msk [vmem:[%s3572_s5 + $0x300] sm:$0xff] %vm1752_vm1, %v1720_v51  ;;  %v1534_v57 = vadd.f32 %v2800_v49, %v1315_v41 }
 0x1ec   :  { %1850 = vst.msk [vmem:[%s3572_s5 + $0x308] sm:$0xff] %vm1752_vm1, %v1721_v54  ;;  %v1535_v56 = vadd.f32 %v2800_v49, %v1317_v55 }
 0x1ed   :  { %v1662_v60 = vmax.f32 %v1534_v57, 0.0 }
 0x1ee   :  { %v1663_v58 = vmax.f32 %v1535_v56, 0.0  ;;  %v1443_v62 = vpop.xlane.xlu0 %1442 }
 0x1ef   :  { %v1445_v61 = vpop.xlane.xlu1 %1444  ;;  %1791 = vst.msk [vmem:[%s3572_s5 + $0x130] sm:$0xff] %vm1752_vm1, %v1662_v60  ;;  %v1598_v0 = vadd.f32 %v2800_v49, %v1443_v62 }
 0x1f0   :  { %1792 = vst.msk [vmem:[%s3572_s5 + $0x138] sm:$0xff] %vm1752_vm1, %v1663_v58  ;;  %v1599_v63 = vadd.f32 %v2800_v49, %v1445_v61 }
 0x1f1   :  { %v1726_v3 = vmax.f32 %v1598_v0, 0.0 }
 0x1f2   :  { %v1727_v1 = vmax.f32 %v1599_v63, 0.0  ;;  %v1311_v5 = vpop.xlane.xlu0 %1310 }
 0x1f3   :  { %v1313_v4 = vpop.xlane.xlu1 %1312  ;;  %1855 = vst.msk [vmem:[%s3572_s5 + $0x330] sm:$0xff] %vm1752_vm1, %v1726_v3  ;;  %v1532_v7 = vadd.f32 %v2800_v49, %v1311_v5 }
 0x1f4   :  { %1856 = vst.msk [vmem:[%s3572_s5 + $0x338] sm:$0xff] %vm1752_vm1, %v1727_v1  ;;  %v1533_v6 = vadd.f32 %v2800_v49, %v1313_v4 }
 0x1f5   :  { %v1660_v9 = vmax.f32 %v1532_v7, 0.0 }
 0x1f6   :  { %v1661_v8 = vmax.f32 %v1533_v6, 0.0  ;;  %v1439_v11 = vpop.xlane.xlu0 %1438 }
 0x1f7   :  { %v1441_v10 = vpop.xlane.xlu1 %1440  ;;  %1789 = vst.msk [vmem:[%s3572_s5 + $0x120] sm:$0xff] %vm1752_vm1, %v1660_v9  ;;  %v1596_v14 = vadd.f32 %v2800_v49, %v1439_v11 }
 0x1f8   :  { %1790 = vst.msk [vmem:[%s3572_s5 + $0x128] sm:$0xff] %vm1752_vm1, %v1661_v8  ;;  %v1597_v13 = vadd.f32 %v2800_v49, %v1441_v10 }
 0x1f9   :  { %v1724_v15 = vmax.f32 %v1596_v14, 0.0 }
 0x1fa   :  { %v1725_v59 = vmax.f32 %v1597_v13, 0.0  ;;  %v1323_v17 = vpop.xlane.xlu0 %1322 }
 0x1fb   :  { %v1325_v16 = vpop.xlane.xlu1 %1324  ;;  %1853 = vst.msk [vmem:[%s3572_s5 + $0x320] sm:$0xff] %vm1752_vm1, %v1724_v15  ;;  %v1538_v19 = vadd.f32 %v2800_v49, %v1323_v17 }
 0x1fc   :  { %1854 = vst.msk [vmem:[%s3572_s5 + $0x328] sm:$0xff] %vm1752_vm1, %v1725_v59  ;;  %v1539_v18 = vadd.f32 %v2800_v49, %v1325_v16 }
 0x1fd   :  { %v1666_v21 = vmax.f32 %v1538_v19, 0.0 }
 0x1fe   :  { %v1667_v20 = vmax.f32 %v1539_v18, 0.0  ;;  %v1451_v23 = vpop.xlane.xlu0 %1450 }
 0x1ff   :  { %v1453_v22 = vpop.xlane.xlu1 %1452  ;;  %1795 = vst.msk [vmem:[%s3572_s5 + $0x150] sm:$0xff] %vm1752_vm1, %v1666_v21  ;;  %v1602_v25 = vadd.f32 %v2800_v49, %v1451_v23 }
 0x200   :  { %1796 = vst.msk [vmem:[%s3572_s5 + $0x158] sm:$0xff] %vm1752_vm1, %v1667_v20  ;;  %v1603_v24 = vadd.f32 %v2800_v49, %v1453_v22 }
 0x201   :  { %v1730_v27 = vmax.f32 %v1602_v25, 0.0 }
 0x202   :  { %v1731_v26 = vmax.f32 %v1603_v24, 0.0  ;;  %v1319_v29 = vpop.xlane.xlu0 %1318 }
 0x203   :  { %v1321_v28 = vpop.xlane.xlu1 %1320  ;;  %1859 = vst.msk [vmem:[%s3572_s5 + $0x350] sm:$0xff] %vm1752_vm1, %v1730_v27  ;;  %v1536_v31 = vadd.f32 %v2800_v49, %v1319_v29 }
 0x204   :  { %1860 = vst.msk [vmem:[%s3572_s5 + $0x358] sm:$0xff] %vm1752_vm1, %v1731_v26  ;;  %v1537_v30 = vadd.f32 %v2800_v49, %v1321_v28 }
 0x205   :  { %v1664_v33 = vmax.f32 %v1536_v31, 0.0 }
 0x206   :  { %v1665_v32 = vmax.f32 %v1537_v30, 0.0  ;;  %v1447_v35 = vpop.xlane.xlu0 %1446 }
 0x207   :  { %v1449_v34 = vpop.xlane.xlu1 %1448  ;;  %1793 = vst.msk [vmem:[%s3572_s5 + $0x140] sm:$0xff] %vm1752_vm1, %v1664_v33  ;;  %v1600_v37 = vadd.f32 %v2800_v49, %v1447_v35 }
 0x208   :  { %1794 = vst.msk [vmem:[%s3572_s5 + $0x148] sm:$0xff] %vm1752_vm1, %v1665_v32  ;;  %v1601_v36 = vadd.f32 %v2800_v49, %v1449_v34 }
 0x209   :  { %v1728_v39 = vmax.f32 %v1600_v37, 0.0 }
 0x20a   :  { %v1729_v38 = vmax.f32 %v1601_v36, 0.0  ;;  %v1331_v42 = vpop.xlane.xlu0 %1330 }
 0x20b   :  { %v1333_v40 = vpop.xlane.xlu1 %1332  ;;  %1857 = vst.msk [vmem:[%s3572_s5 + $0x340] sm:$0xff] %vm1752_vm1, %v1728_v39  ;;  %v1542_v43 = vadd.f32 %v2800_v49, %v1331_v42 }
 0x20c   :  { %1858 = vst.msk [vmem:[%s3572_s5 + $0x348] sm:$0xff] %vm1752_vm1, %v1729_v38  ;;  %v1543_v2 = vadd.f32 %v2800_v49, %v1333_v40 }
 0x20d   :  { %v1670_v45 = vmax.f32 %v1542_v43, 0.0 }
 0x20e   :  { %v1671_v44 = vmax.f32 %v1543_v2, 0.0  ;;  %v1459_v47 = vpop.xlane.xlu0 %1458 }
 0x20f   :  { %v1461_v46 = vpop.xlane.xlu1 %1460  ;;  %1799 = vst.msk [vmem:[%s3572_s5 + $0x170] sm:$0xff] %vm1752_vm1, %v1670_v45  ;;  %v1606_v50 = vadd.f32 %v2800_v49, %v1459_v47 }
 0x210   :  { %1800 = vst.msk [vmem:[%s3572_s5 + $0x178] sm:$0xff] %vm1752_vm1, %v1671_v44  ;;  %v1607_v48 = vadd.f32 %v2800_v49, %v1461_v46 }
 0x211   :  { %v1734_v12 = vmax.f32 %v1606_v50, 0.0 }
 0x212   :  { %v1735_v52 = vmax.f32 %v1607_v48, 0.0  ;;  %v1327_v54 = vpop.xlane.xlu0 %1326 }
 0x213   :  { %v1329_v53 = vpop.xlane.xlu1 %1328  ;;  %1863 = vst.msk [vmem:[%s3572_s5 + $0x370] sm:$0xff] %vm1752_vm1, %v1734_v12  ;;  %v1540_v55 = vadd.f32 %v2800_v49, %v1327_v54 }
 0x214   :  { %1864 = vst.msk [vmem:[%s3572_s5 + $0x378] sm:$0xff] %vm1752_vm1, %v1735_v52  ;;  %v1541_v51 = vadd.f32 %v2800_v49, %v1329_v53 }
 0x215   :  { %v1668_v56 = vmax.f32 %v1540_v55, 0.0 }
 0x216   :  { %v1669_v41 = vmax.f32 %v1541_v51, 0.0  ;;  %v1455_v58 = vpop.xlane.xlu0 %1454 }
 0x217   :  { %v1457_v57 = vpop.xlane.xlu1 %1456  ;;  %1797 = vst.msk [vmem:[%s3572_s5 + $0x160] sm:$0xff] %vm1752_vm1, %v1668_v56  ;;  %v1604_v61 = vadd.f32 %v2800_v49, %v1455_v58 }
 0x218   :  { %1798 = vst.msk [vmem:[%s3572_s5 + $0x168] sm:$0xff] %vm1752_vm1, %v1669_v41  ;;  %v1605_v60 = vadd.f32 %v2800_v49, %v1457_v57 }
 0x219   :  { %v1732_v63 = vmax.f32 %v1604_v61, 0.0 }
 0x21a   :  { %v1733_v62 = vmax.f32 %v1605_v60, 0.0  ;;  %v1339_v1 = vpop.xlane.xlu0 %1338 }
 0x21b   :  { %v1341_v0 = vpop.xlane.xlu1 %1340  ;;  %1861 = vst.msk [vmem:[%s3572_s5 + $0x360] sm:$0xff] %vm1752_vm1, %v1732_v63  ;;  %v1546_v4 = vadd.f32 %v2800_v49, %v1339_v1 }
 0x21c   :  { %1862 = vst.msk [vmem:[%s3572_s5 + $0x368] sm:$0xff] %vm1752_vm1, %v1733_v62  ;;  %v1547_v3 = vadd.f32 %v2800_v49, %v1341_v0 }
 0x21d   :  { %v1674_v6 = vmax.f32 %v1546_v4, 0.0 }
 0x21e   :  { %v1675_v5 = vmax.f32 %v1547_v3, 0.0  ;;  %v1467_v8 = vpop.xlane.xlu0 %1466 }
 0x21f   :  { %v1469_v7 = vpop.xlane.xlu1 %1468  ;;  %1803 = vst.msk [vmem:[%s3572_s5 + $0x190] sm:$0xff] %vm1752_vm1, %v1674_v6  ;;  %v1610_v10 = vadd.f32 %v2800_v49, %v1467_v8 }
 0x220   :  { %1804 = vst.msk [vmem:[%s3572_s5 + $0x198] sm:$0xff] %vm1752_vm1, %v1675_v5  ;;  %v1611_v9 = vadd.f32 %v2800_v49, %v1469_v7 }
 0x221   :  { %v1738_v13 = vmax.f32 %v1610_v10, 0.0 }
 0x222   :  { %v1739_v11 = vmax.f32 %v1611_v9, 0.0  ;;  %v1335_v59 = vpop.xlane.xlu0 %1334 }
 0x223   :  { %v1337_v14 = vpop.xlane.xlu1 %1336  ;;  %1867 = vst.msk [vmem:[%s3572_s5 + $0x390] sm:$0xff] %vm1752_vm1, %v1738_v13  ;;  %v1544_v16 = vadd.f32 %v2800_v49, %v1335_v59 }
 0x224   :  { %1868 = vst.msk [vmem:[%s3572_s5 + $0x398] sm:$0xff] %vm1752_vm1, %v1739_v11  ;;  %v1545_v15 = vadd.f32 %v2800_v49, %v1337_v14 }
 0x225   :  { %v1672_v18 = vmax.f32 %v1544_v16, 0.0 }
 0x226   :  { %v1673_v17 = vmax.f32 %v1545_v15, 0.0  ;;  %v1463_v20 = vpop.xlane.xlu0 %1462 }
 0x227   :  { %v1465_v19 = vpop.xlane.xlu1 %1464  ;;  %1801 = vst.msk [vmem:[%s3572_s5 + $0x180] sm:$0xff] %vm1752_vm1, %v1672_v18  ;;  %v1608_v22 = vadd.f32 %v2800_v49, %v1463_v20 }
 0x228   :  { %1802 = vst.msk [vmem:[%s3572_s5 + $0x188] sm:$0xff] %vm1752_vm1, %v1673_v17  ;;  %v1609_v21 = vadd.f32 %v2800_v49, %v1465_v19 }
 0x229   :  { %v1736_v24 = vmax.f32 %v1608_v22, 0.0 }
 0x22a   :  { %v1737_v23 = vmax.f32 %v1609_v21, 0.0  ;;  %v1347_v26 = vpop.xlane.xlu0 %1346 }
 0x22b   :  { %v1349_v25 = vpop.xlane.xlu1 %1348  ;;  %1865 = vst.msk [vmem:[%s3572_s5 + $0x380] sm:$0xff] %vm1752_vm1, %v1736_v24  ;;  %v1550_v28 = vadd.f32 %v2800_v49, %v1347_v26 }
 0x22c   :  { %1866 = vst.msk [vmem:[%s3572_s5 + $0x388] sm:$0xff] %vm1752_vm1, %v1737_v23  ;;  %v1551_v27 = vadd.f32 %v2800_v49, %v1349_v25 }
 0x22d   :  { %v1678_v30 = vmax.f32 %v1550_v28, 0.0 }
 0x22e   :  { %v1679_v29 = vmax.f32 %v1551_v27, 0.0  ;;  %v1475_v32 = vpop.xlane.xlu0 %1474 }
 0x22f   :  { %v1477_v31 = vpop.xlane.xlu1 %1476  ;;  %1807 = vst.msk [vmem:[%s3572_s5 + $0x1b0] sm:$0xff] %vm1752_vm1, %v1678_v30  ;;  %v1614_v34 = vadd.f32 %v2800_v49, %v1475_v32 }
 0x230   :  { %1808 = vst.msk [vmem:[%s3572_s5 + $0x1b8] sm:$0xff] %vm1752_vm1, %v1679_v29  ;;  %v1615_v33 = vadd.f32 %v2800_v49, %v1477_v31 }
 0x231   :  { %v1742_v36 = vmax.f32 %v1614_v34, 0.0 }
 0x232   :  { %v1743_v35 = vmax.f32 %v1615_v33, 0.0  ;;  %v1343_v38 = vpop.xlane.xlu0 %1342 }
 0x233   :  { %v1345_v37 = vpop.xlane.xlu1 %1344  ;;  %1871 = vst.msk [vmem:[%s3572_s5 + $0x3b0] sm:$0xff] %vm1752_vm1, %v1742_v36  ;;  %v1548_v40 = vadd.f32 %v2800_v49, %v1343_v38 }
 0x234   :  { %1872 = vst.msk [vmem:[%s3572_s5 + $0x3b8] sm:$0xff] %vm1752_vm1, %v1743_v35  ;;  %v1549_v39 = vadd.f32 %v2800_v49, %v1345_v37 }
 0x235   :  { %v1676_v2 = vmax.f32 %v1548_v40, 0.0 }
 0x236   :  { %v1677_v42 = vmax.f32 %v1549_v39, 0.0  ;;  %v1471_v44 = vpop.xlane.xlu0 %1470 }
 0x237   :  { %v1473_v43 = vpop.xlane.xlu1 %1472  ;;  %1805 = vst.msk [vmem:[%s3572_s5 + $0x1a0] sm:$0xff] %vm1752_vm1, %v1676_v2  ;;  %v1612_v46 = vadd.f32 %v2800_v49, %v1471_v44 }
 0x238   :  { %1806 = vst.msk [vmem:[%s3572_s5 + $0x1a8] sm:$0xff] %vm1752_vm1, %v1677_v42  ;;  %v1613_v45 = vadd.f32 %v2800_v49, %v1473_v43 }
 0x239   :  { %v1740_v48 = vmax.f32 %v1612_v46, 0.0 }
 0x23a   :  { %v1741_v47 = vmax.f32 %v1613_v45, 0.0  ;;  %v1355_v52 = vpop.xlane.xlu0 %1354 }
 0x23b   :  { %v1357_v50 = vpop.xlane.xlu1 %1356  ;;  %1869 = vst.msk [vmem:[%s3572_s5 + $0x3a0] sm:$0xff] %vm1752_vm1, %v1740_v48  ;;  %v1554_v53 = vadd.f32 %v2800_v49, %v1355_v52 }
 0x23c   :  { %1870 = vst.msk [vmem:[%s3572_s5 + $0x3a8] sm:$0xff] %vm1752_vm1, %v1741_v47  ;;  %v1555_v12 = vadd.f32 %v2800_v49, %v1357_v50 }
 0x23d   :  { %v1682_v51 = vmax.f32 %v1554_v53, 0.0 }
 0x23e   :  { %v1683_v54 = vmax.f32 %v1555_v12, 0.0  ;;  %v1483_v41 = vpop.xlane.xlu0 %1482 }
 0x23f   :  { %v1485_v55 = vpop.xlane.xlu1 %1484  ;;  %1811 = vst.msk [vmem:[%s3572_s5 + $0x1d0] sm:$0xff] %vm1752_vm1, %v1682_v51  ;;  %v1618_v57 = vadd.f32 %v2800_v49, %v1483_v41 }
 0x240   :  { %1812 = vst.msk [vmem:[%s3572_s5 + $0x1d8] sm:$0xff] %vm1752_vm1, %v1683_v54  ;;  %v1619_v56 = vadd.f32 %v2800_v49, %v1485_v55 }
 0x241   :  { %v1746_v60 = vmax.f32 %v1618_v57, 0.0 }
 0x242   :  { %v1747_v58 = vmax.f32 %v1619_v56, 0.0  ;;  %v1351_v62 = vpop.xlane.xlu0 %1350 }
 0x243   :  { %v1353_v61 = vpop.xlane.xlu1 %1352  ;;  %1875 = vst.msk [vmem:[%s3572_s5 + $0x3d0] sm:$0xff] %vm1752_vm1, %v1746_v60  ;;  %v1552_v0 = vadd.f32 %v2800_v49, %v1351_v62 }
 0x244   :  { %1876 = vst.msk [vmem:[%s3572_s5 + $0x3d8] sm:$0xff] %vm1752_vm1, %v1747_v58  ;;  %v1553_v63 = vadd.f32 %v2800_v49, %v1353_v61 }
 0x245   :  { %v1680_v3 = vmax.f32 %v1552_v0, 0.0 }
 0x246   :  { %v1681_v1 = vmax.f32 %v1553_v63, 0.0  ;;  %v1479_v5 = vpop.xlane.xlu0 %1478 }
 0x247   :  { %v1481_v4 = vpop.xlane.xlu1 %1480  ;;  %1809 = vst.msk [vmem:[%s3572_s5 + $0x1c0] sm:$0xff] %vm1752_vm1, %v1680_v3  ;;  %v1616_v7 = vadd.f32 %v2800_v49, %v1479_v5 }
 0x248   :  { %1810 = vst.msk [vmem:[%s3572_s5 + $0x1c8] sm:$0xff] %vm1752_vm1, %v1681_v1  ;;  %v1617_v6 = vadd.f32 %v2800_v49, %v1481_v4 }
 0x249   :  { %v1744_v9 = vmax.f32 %v1616_v7, 0.0 }
 0x24a   :  { %v1745_v8 = vmax.f32 %v1617_v6, 0.0  ;;  %v1363_v11 = vpop.xlane.xlu0 %1362 }
 0x24b   :  { %v1365_v10 = vpop.xlane.xlu1 %1364  ;;  %1873 = vst.msk [vmem:[%s3572_s5 + $0x3c0] sm:$0xff] %vm1752_vm1, %v1744_v9  ;;  %v1558_v14 = vadd.f32 %v2800_v49, %v1363_v11 }
 0x24c   :  { %1874 = vst.msk [vmem:[%s3572_s5 + $0x3c8] sm:$0xff] %vm1752_vm1, %v1745_v8  ;;  %v1559_v13 = vadd.f32 %v2800_v49, %v1365_v10 }
 0x24d   :  { %v1686_v15 = vmax.f32 %v1558_v14, 0.0 }
 0x24e   :  { %v1687_v59 = vmax.f32 %v1559_v13, 0.0  ;;  %v1359_v17 = vpop.xlane.xlu0 %1358 }
 0x24f   :  { %v1361_v16 = vpop.xlane.xlu1 %1360  ;;  %1815 = vst.msk [vmem:[%s3572_s5 + $0x1f0] sm:$0xff] %vm1752_vm1, %v1686_v15  ;;  %v1556_v19 = vadd.f32 %v2800_v49, %v1359_v17 }
 0x250   :  { %1816 = vst.msk [vmem:[%s3572_s5 + $0x1f8] sm:$0xff] %vm1752_vm1, %v1687_v59  ;;  %v1557_v18 = vadd.f32 %v2800_v49, %v1361_v16 }
 0x251   :  { %v1684_v21 = vmax.f32 %v1556_v19, 0.0 }
 0x252   :  { %v1685_v20 = vmax.f32 %v1557_v18, 0.0  ;;  %v1487_v23 = vpop.xlane.xlu0 %1486 }
 0x253   :  { %v1489_v22 = vpop.xlane.xlu1 %1488  ;;  %1813 = vst.msk [vmem:[%s3572_s5 + $0x1e0] sm:$0xff] %vm1752_vm1, %v1684_v21  ;;  %v1620_v25 = vadd.f32 %v2800_v49, %v1487_v23 }
 0x254   :  { %1814 = vst.msk [vmem:[%s3572_s5 + $0x1e8] sm:$0xff] %vm1752_vm1, %v1685_v20  ;;  %v1621_v24 = vadd.f32 %v2800_v49, %v1489_v22 }
 0x255   :  { %v1748_v27 = vmax.f32 %v1620_v25, 0.0 }
 0x256   :  { %v1749_v26 = vmax.f32 %v1621_v24, 0.0  ;;  %v1491_v29 = vpop.xlane.xlu0 %1490 }
 0x257   :  { %v1493_v28 = vpop.xlane.xlu1 %1492  ;;  %1877 = vst.msk [vmem:[%s3572_s5 + $0x3e0] sm:$0xff] %vm1752_vm1, %v1748_v27  ;;  %v1622_v31 = vadd.f32 %v2800_v49, %v1491_v29 }
 0x258   :  { %1878 = vst.msk [vmem:[%s3572_s5 + $0x3e8] sm:$0xff] %vm1752_vm1, %v1749_v26  ;;  %v1623_v30 = vadd.f32 %v2800_v49, %v1493_v28 }
 0x259   :  { %v1750_v33 = vmax.f32 %v1622_v31, 0.0 }
 0x25a   :  { %v1751_v32 = vmax.f32 %v1623_v30, 0.0 }
 0x25b   :  { %1879 = vst.msk [vmem:[%s3572_s5 + $0x3f0] sm:$0xff] %vm1752_vm1, %v1750_v33 }
 0x25c   :  { %1880 = vst.msk [vmem:[%s3572_s5 + $0x3f8] sm:$0xff] %vm1752_vm1, %v1751_v32 }

</bundles_post_ra>
